<compile_context>
chip_gen: v7x
topology: tpu7x:2x2x1
jax: 0.10.0
libtpu: 0.0.40
codegen_flags: <defaults>
</compile_context>

<pallas_src>
import jax
import jax.numpy as jnp
from jax.experimental import pallas as pl
from jax.experimental.pallas import tpu as pltpu


K_IN = 784        # logical input features (28*28)
H = 256           # hidden size
N_OUT = 10        # logical output classes
N_PAD = 128       # lane-dense output width

TM_MAX = 1024             # max batch-tile rows (~10 MiB VMEM incl. double-buffering)
MIN_PALLAS_BATCH = 128    # below this, use the plain-XLA fallback


def _round_up(x, m):
    return (x + m - 1) // m * m


def _choose_tm(B):
    # At least 2 batch tiles whenever possible (v7x has 2 TensorCores and the
    # batch axis is marked "parallel"), tile rows a multiple of 128, capped so
    # the double-buffered f32 x tiles stay well inside scoped VMEM.
    half = _round_up((B + 1) // 2, 128)
    return max(128, min(TM_MAX, half))


def _mlp_kernel(x_ref, w1_ref, b1_ref, w2_ref, b2_ref, o_ref):
    # x_ref: (TM, 784) f32 | w1_ref: (784, 256) bf16 | b1_ref: (1, 256) f32
    # w2_ref: (256, 128) bf16 | b2_ref: (1, 128) f32 | o_ref: (TM, 128) bf16
    x = x_ref[...].astype(jnp.bfloat16)                               # cast in VMEM
    h = jnp.dot(x, w1_ref[...], preferred_element_type=jnp.float32)  # (TM, 256) f32
    h = jnp.maximum(h + b1_ref[...], 0.0)                            # bias + ReLU
    out = jnp.dot(h.astype(jnp.bfloat16), w2_ref[...],
                  preferred_element_type=jnp.float32)                # (TM, 128) f32
    o_ref[...] = (out + b2_ref[...]).astype(o_ref.dtype)             # bf16, lane-dense


def prepare_params(w1, b1, w2, b2):
    """One-time parameter prep (hoisted out of the per-call forward path).

    w1: (784, 256), b1: (256,), w2: (256, 10), b2: (10,)
    """
    w1_p = w1.astype(jnp.bfloat16)                                   # (784, 256)
    b1_p = b1.reshape(1, H).astype(jnp.float32)                      # (1, 256)
    # Lane-dense output: pad N 10 -> 128 with zero weight columns / biases.
    w2_p = jnp.pad(w2, ((0, 0), (0, N_PAD - N_OUT))).astype(jnp.bfloat16)   # (256, 128)
    b2_p = jnp.pad(b2, (0, N_PAD - N_OUT)).reshape(1, N_PAD).astype(jnp.float32)
    return w1_p, b1_p, w2_p, b2_p


def _xla_fallback(x2d, w1_p, b1_p, w2_p, b2_p):
    # Tiny-batch path: launch/padding overhead would dominate the kernel.
    h = jnp.maximum(jnp.dot(x2d, w1_p.astype(jnp.float32)) + b1_p, 0.0)
    out = jnp.dot(h, w2_p.astype(jnp.float32)) + b2_p
    return out[:, :N_OUT]


def mlp_forward(x, prepped_params):
    """Forward pass of the two-layer MLP.

    x : (..., 784) float32, flattened to (B, 784) like `inp.view(-1, 784)`.
    prepped_params: output of prepare_params(w1, b1, w2, b2).
    returns (B, 10) float32
    """
    w1_p, b1_p, w2_p, b2_p = prepped_params
    x2d = x.reshape(-1, K_IN).astype(jnp.float32)
    B = x2d.shape[0]

    if B < MIN_PALLAS_BATCH:
        return _xla_fallback(x2d, w1_p, b1_p, w2_p, b2_p)

    TM = _choose_tm(B)
    B_pad = _round_up(B, TM)
    if B_pad != B:
        x2d = jnp.pad(x2d, ((0, B_pad - B), (0, 0)))

    grid = (B_pad // TM,)
    out_padded = pl.pallas_call(
        _mlp_kernel,
        out_shape=jax.ShapeDtypeStruct((B_pad, N_PAD), jnp.bfloat16),
        grid_spec=pltpu.PrefetchScalarGridSpec(
            num_scalar_prefetch=0,
            grid=grid,
            in_specs=[
                # x streams per batch tile; last block dim == full array dim (784).
                pl.BlockSpec((TM, K_IN), lambda i: (i, 0)),
                pl.BlockSpec((K_IN, H), lambda i: (0, 0)),     # w1 resident
                pl.BlockSpec((1, H), lambda i: (0, 0)),        # b1 resident
                pl.BlockSpec((H, N_PAD), lambda i: (0, 0)),    # w2 resident
                pl.BlockSpec((1, N_PAD), lambda i: (0, 0)),    # b2 resident
            ],
            out_specs=pl.BlockSpec((TM, N_PAD), lambda i: (i, 0)),
        ),
        compiler_params=pltpu.CompilerParams(
            dimension_semantics=("parallel",),   # shard batch tiles across TCs
            vmem_limit_bytes=32 * 1024 * 1024,   # headroom for TM=1024 on v5e
        ),
    )(x2d, w1_p, b1_p, w2_p, b2_p)

    # Strip batch padding + lane padding; restore f32 logits (tiny 10-col op).
    # TODO(synk): fuse the downstream consumer (softmax/argmax/loss) into the
    # kernel to eliminate the logits writeback entirely.
    return out_padded[:B, :N_OUT].astype(jnp.float32)


def init_params(key):
    """Deterministic init mirroring nn.Linear's uniform(-1/sqrt(fan_in), +)."""
    k1, k2, k3, k4 = jax.random.split(key, 4)
    lim1 = 1.0 / jnp.sqrt(784.0)
    lim2 = 1.0 / jnp.sqrt(256.0)
    w1 = jax.random.uniform(k1, (K_IN, H), jnp.float32, -lim1, lim1)
    b1 = jax.random.uniform(k2, (H,), jnp.float32, -lim1, lim1)
    w2 = jax.random.uniform(k3, (H, N_OUT), jnp.float32, -lim2, lim2)
    b2 = jax.random.uniform(k4, (N_OUT,), jnp.float32, -lim2, lim2)
    return w1, b1, w2, b2


if __name__ == "__main__":
    key = jax.random.PRNGKey(0)
    kx, kp = jax.random.split(key)

    w1, b1, w2, b2 = init_params(kp)
    prepped = prepare_params(w1, b1, w2, b2)   # one-time prep, outside forward

    # Batch large enough to exercise the Pallas path (TM=128 -> 2 batch tiles).
    x = jax.random.normal(kx, (256, 1, 28, 28), jnp.float32)
    out = jax.block_until_ready(mlp_forward(x, prepped))

    x2d = x.reshape(-1, K_IN)
    ref = jnp.maximum(x2d @ w1 + b1, 0.0) @ w2 + b2
    assert out.shape == (256, N_OUT)
    assert jnp.allclose(out, ref, atol=3e-2, rtol=3e-2), (
        float(jnp.max(jnp.abs(out - ref))))

    # Tiny batch (MNIST-style B=8) goes through the XLA fallback path.
    kx2 = jax.random.split(kx)[0]
    x_small = jax.random.normal(kx2, (8, 1, 28, 28), jnp.float32)
    out_small = jax.block_until_ready(mlp_forward(x_small, prepped))
    ref_small = jnp.maximum(x_small.reshape(-1, K_IN) @ w1 + b1, 0.0) @ w2 + b2
    assert out_small.shape == (8, N_OUT)
    assert jnp.allclose(out_small, ref_small, atol=3e-2, rtol=3e-2), (
        float(jnp.max(jnp.abs(out_small - ref_small))))

    print("KERNEL_OK")
</pallas_src>

<mosaic_0001>
module attributes {stable_mosaic.version = 11 : i64} {
  func.func @_mlp_kernel(%arg0: i32, %arg1: memref<128x784xf32, #tpu.memory_space<vmem>>, %arg2: memref<784x256xbf16, #tpu.memory_space<vmem>>, %arg3: memref<1x256xf32, #tpu.memory_space<vmem>>, %arg4: memref<256x128xbf16, #tpu.memory_space<vmem>>, %arg5: memref<1x128xf32, #tpu.memory_space<vmem>>, %arg6: memref<128x128xbf16, #tpu.memory_space<vmem>>) attributes {dimension_semantics = [#tpu.dimension_semantics<parallel>], iteration_bounds = array<i64: 2>, scalar_prefetch = 0 : i64, scratch_operands = 0 : i64, tpu.core_type = #tpu.core_type<tc>, window_params = [{transform_indices = @transform_0, window_bounds = array<i64: 128, 784>}, {pipeline_mode = #tpu.pipeline_mode<synchronous>, transform_indices = @transform_1, window_bounds = array<i64: 784, 256>}, {pipeline_mode = #tpu.pipeline_mode<synchronous>, transform_indices = @transform_2, window_bounds = array<i64: 1, 256>}, {pipeline_mode = #tpu.pipeline_mode<synchronous>, transform_indices = @transform_3, window_bounds = array<i64: 256, 128>}, {pipeline_mode = #tpu.pipeline_mode<synchronous>, transform_indices = @transform_4, window_bounds = array<i64: 1, 128>}, {transform_indices = @transform_5, window_bounds = array<i64: 128, 128>}]} {
    %c0 = arith.constant 0 : index
    %c0_0 = arith.constant 0 : index
    %0 = vector.load %arg1[%c0, %c0_0] : memref<128x784xf32, #tpu.memory_space<vmem>>, vector<128x784xf32>
    %1 = arith.truncf %0 : vector<128x784xf32> to vector<128x784xbf16>
    %c0_1 = arith.constant 0 : index
    %c0_2 = arith.constant 0 : index
    %2 = vector.load %arg2[%c0_1, %c0_2] : memref<784x256xbf16, #tpu.memory_space<vmem>>, vector<784x256xbf16>
    %cst = arith.constant dense<0.000000e+00> : vector<128x256xf32>
    %3 = tpu.matmul %1, %2, %cst {dimension_numbers = #tpu.dot_dimension_numbers<[1], [0], [0], [1], [0, 0, 1, 1], [], []>} : vector<128x784xbf16>, vector<784x256xbf16>, vector<128x256xf32> -> vector<128x256xf32>
    %c0_3 = arith.constant 0 : index
    %c0_4 = arith.constant 0 : index
    %4 = vector.load %arg3[%c0_3, %c0_4] : memref<1x256xf32, #tpu.memory_space<vmem>>, vector<1x256xf32>
    %5 = vector.broadcast %4 : vector<1x256xf32> to vector<128x256xf32>
    %6 = arith.addf %3, %5 : vector<128x256xf32>
    %cst_5 = arith.constant 0.000000e+00 : f32
    %7 = vector.broadcast %cst_5 : f32 to vector<128x256xf32>
    %8 = arith.maximumf %6, %7 : vector<128x256xf32>
    %9 = arith.truncf %8 : vector<128x256xf32> to vector<128x256xbf16>
    %c0_6 = arith.constant 0 : index
    %c0_7 = arith.constant 0 : index
    %10 = vector.load %arg4[%c0_6, %c0_7] : memref<256x128xbf16, #tpu.memory_space<vmem>>, vector<256x128xbf16>
    %cst_8 = arith.constant dense<0.000000e+00> : vector<128x128xf32>
    %11 = tpu.matmul %9, %10, %cst_8 {dimension_numbers = #tpu.dot_dimension_numbers<[1], [0], [0], [1], [0, 0, 1, 1], [], []>} : vector<128x256xbf16>, vector<256x128xbf16>, vector<128x128xf32> -> vector<128x128xf32>
    %c0_9 = arith.constant 0 : index
    %c0_10 = arith.constant 0 : index
    %12 = vector.load %arg5[%c0_9, %c0_10] : memref<1x128xf32, #tpu.memory_space<vmem>>, vector<1x128xf32>
    %13 = vector.broadcast %12 : vector<1x128xf32> to vector<128x128xf32>
    %14 = arith.addf %11, %13 : vector<128x128xf32>
    %15 = arith.truncf %14 : vector<128x128xf32> to vector<128x128xbf16>
    %c0_11 = arith.constant 0 : index
    %c0_12 = arith.constant 0 : index
    %16 = vector.load %arg6[%c0_11, %c0_12] : memref<128x128xbf16, #tpu.memory_space<vmem>>, vector<128x128xbf16>
    tpu.vector_store %arg6[%c0_11, %c0_12], %15 {strides = array<i32>} : memref<128x128xbf16, #tpu.memory_space<vmem>>, vector<128x128xbf16>,
    return
  }
  func.func @transform_0(%arg0: i32) -> (i32, i32) {
    %c0_i32 = arith.constant 0 : i32
    %c0_i32_0 = arith.constant 0 : i32
    return %arg0, %c0_i32 : i32, i32
  }
  func.func @transform_1(%arg0: i32) -> (i32, i32) {
    %c0_i32 = arith.constant 0 : i32
    %c0_i32_0 = arith.constant 0 : i32
    %c0_i32_1 = arith.constant 0 : i32
    return %c0_i32, %c0_i32_0 : i32, i32
  }
  func.func @transform_2(%arg0: i32) -> (i32, i32) {
    %c0_i32 = arith.constant 0 : i32
    %c0_i32_0 = arith.constant 0 : i32
    %c0_i32_1 = arith.constant 0 : i32
    return %c0_i32, %c0_i32_0 : i32, i32
  }
  func.func @transform_3(%arg0: i32) -> (i32, i32) {
    %c0_i32 = arith.constant 0 : i32
    %c0_i32_0 = arith.constant 0 : i32
    %c0_i32_1 = arith.constant 0 : i32
    return %c0_i32, %c0_i32_0 : i32, i32
  }
  func.func @transform_4(%arg0: i32) -> (i32, i32) {
    %c0_i32 = arith.constant 0 : i32
    %c0_i32_0 = arith.constant 0 : i32
    %c0_i32_1 = arith.constant 0 : i32
    return %c0_i32, %c0_i32_0 : i32, i32
  }
  func.func @transform_5(%arg0: i32) -> (i32, i32) {
    %c0_i32 = arith.constant 0 : i32
    %c0_i32_0 = arith.constant 0 : i32
    return %arg0, %c0_i32 : i32, i32
  }
}

</mosaic_0001>

<bundles_post_ra>
// kernel: tpu_custom_call.1
= control target key start
LH: loop header
LB: loop body
LE: loop exit
PB: predicated region body
PF: predicated region fallthrough
CT: control target
= control target key end

     0   :  { %10 = vsyncpa [#allocation3], 0  ;;  %s3391_s0 = inlined_call_operand.vmem [shape: f32[256,784], index: 0, kind: input, shape index: {}]   ;;  %s3392_s1 = inlined_call_operand.vmem [shape: bf16[784,256], index: 1, kind: input, shape index: {}]   ;;  %s3393_s2 = inlined_call_operand.vmem [shape: f32[1,256], index: 2, kind: input, shape index: {}]   ;;  %s3394_s3 = inlined_call_operand.vmem [shape: bf16[256,128], index: 3, kind: input, shape index: {}]   ;;  %s3395_s4 = inlined_call_operand.vmem [shape: f32[1,128], index: 4, kind: input, shape index: {}]   ;;  %s3396_s5 = inlined_call_operand.hbm [shape: bf16[256,128], index: 5, kind: output, shape index: {}]  }
   0x1   :  { %12 = vsyncpa [#allocation3 + $0x1], 0  ;;  %s2654_s18 = smov 0   ;;  %s2656_s19 = smov 0  }
   0x2   :  { %s2658_s20 = smov 0   ;;  %s2660_s21 = smov 0  }
   0x3 LB: > { %s2675_s22 = sadd.s32 4294967295, %s2618_s21   ;;  %s1911_s23 = sadd.s32 4294967294, %s2618_s21   ;;  %s2618_s21 = sphi %s2660_s21, %s3402_s21   ;;  %s2614_s20 = sphi %s2658_s20, %s3401_s20   ;;  %s2610_s19 = sphi %s2656_s19, %s3400_s19   ;;  %s2606_s18 = sphi %s2654_s18, %s3399_s18  }
   0x4   : > { %s2679_s24 = sadd.s32 1, %s2618_s21   ;;  %s135_s25 = sadd.s32 1, %s2614_s20 }
   0x5   : > { %s132_s26 = ssub.s32 %s2618_s21, %s2679_s24  ;;  %p145_p0 = scmp.ne.s32.totalorder %s2614_s20, %s2610_s19 }
   0x6   : > { %p133_p1 = scmp.eq.s32.totalorder %s132_s26, 0  ;;  %p146_p2 = scmp.eq.s32.totalorder %s2675_s22, 1 }
   0x7   : > { %p151_p3 = scmp.ne.s32.totalorder %s2610_s19, %s2606_s18  ;;  %p152_p4 = scmp.eq.s32.totalorder %s1911_s23, 1 }
   0x8   : > { %s2690_s27 = scalar_select %p133_p1, %s2614_s20, %s135_s25  }
   0x9   : > { %p2692_p5 = por %p146_p2, %p145_p0  ;;  %p2696_p6 = por %p152_p4, %p151_p3 }
   0xa   : > { %p1914_p7 = scmp.ge.s32.totalorder %s2618_s21, 1  ;;  %p192_p8 = scmp.lt.s32.totalorder %s2618_s21, 3 }
   0xc   : > { %p193_p9 = pnand %p1914_p7, %p192_p8 }
   0xd   : > { %v2393_v0 = vld [vmem:[%s3392_s1 + $0x4] ss:$8 sps:$4 sm:$0xff] (!%p193_p9)   ;;  %v2397_v2 = vld [vmem:[%s3392_s1] ss:$8 sps:$4 sm:$0xff] (!%p193_p9)   ;;  %v2399_v4 = vld [vmem:[%s3392_s1 + $0x14] ss:$8 sps:$4 sm:$0xff] (!%p193_p9)  }
   0xe   : > { %196 = sbr.rel (%p193_p9) target bundleno = 689 (0x2b1), region = 40  ;;  %v2395_v1 = vld [vmem:[%s3392_s1 + $0x104] ss:$8 sps:$4 sm:$0xff] (!%p193_p9)   ;;  %1023 = vmatprep.subr.bf16.mxu1 (!%p193_p9), %v2393_v0  ;;  %v2398_v3 = vld [vmem:[%s3392_s1 + $0x100] ss:$8 sps:$4 sm:$0xff] (!%p193_p9)   ;;  %s1916_s15 = sshll.u32 (!%p193_p9), %s2675_s22, 4 }
   0xf   : > { %1136 = vmatprep.subr.bf16.mxu0 (!%p193_p9), %v2395_v1  ;;  %1024 = vmatpush1.bf16.msra.mxu1 (!%p193_p9), %v2397_v2  ;;  %v2401_v5 = vld [vmem:[%s3392_s1 + $0x114] ss:$8 sps:$4 sm:$0xff] (!%p193_p9)   ;;  %v2403_v6 = vld [vmem:[%s3392_s1 + $0x10] ss:$8 sps:$4 sm:$0xff] (!%p193_p9)   ;;  %v2405_v8 = vld [vmem:[%s3392_s1 + $0x24] ss:$8 sps:$4 sm:$0xff] (!%p193_p9)  }
  0x10   : > { %1137 = vmatpush1.bf16.msra.mxu0 (!%p193_p9), %v2398_v3  ;;  %1025 = vmatprep.subr.bf16.mxu1 (!%p193_p9), %v2399_v4  ;;  %v2404_v7 = vld [vmem:[%s3392_s1 + $0x110] ss:$8 sps:$4 sm:$0xff] (!%p193_p9)   ;;  %v2407_v9 = vld [vmem:[%s3392_s1 + $0x124] ss:$8 sps:$4 sm:$0xff] (!%p193_p9)   ;;  %v2409_v10 = vld [vmem:[%s3392_s1 + $0x20] ss:$8 sps:$4 sm:$0xff] (!%p193_p9)  }
  0x11   : > { %1138 = vmatprep.subr.bf16.mxu0 (!%p193_p9), %v2401_v5  ;;  %v2410_v11 = vld [vmem:[%s3392_s1 + $0x120] ss:$8 sps:$4 sm:$0xff] (!%p193_p9)   ;;  %v2411_v12 = vld [vmem:[%s3392_s1 + $0x34] ss:$8 sps:$4 sm:$0xff] (!%p193_p9)   ;;  %v2415_v14 = vld [vmem:[%s3392_s1 + $0x30] ss:$8 sps:$4 sm:$0xff] (!%p193_p9)  }
  0x12   : > { %v2413_v13 = vld [vmem:[%s3392_s1 + $0x134] ss:$8 sps:$4 sm:$0xff] (!%p193_p9)   ;;  %v2416_v15 = vld [vmem:[%s3392_s1 + $0x130] ss:$8 sps:$4 sm:$0xff] (!%p193_p9)   ;;  %v2417_v16 = vld [vmem:[%s3392_s1 + $0x44] ss:$8 sps:$4 sm:$0xff] (!%p193_p9)  }
  0x13   : > { %1026 = vmatpush1.bf16.msra.mxu1 (!%p193_p9), %v2403_v6  ;;  %v2419_v17 = vld [vmem:[%s3392_s1 + $0x144] ss:$8 sps:$4 sm:$0xff] (!%p193_p9)   ;;  %v2421_v18 = vld [vmem:[%s3392_s1 + $0x40] ss:$8 sps:$4 sm:$0xff] (!%p193_p9)   ;;  %v2423_v20 = vld [vmem:[%s3392_s1 + $0x54] ss:$8 sps:$4 sm:$0xff] (!%p193_p9)  }
  0x14   : > { %1139 = vmatpush1.bf16.msra.mxu0 (!%p193_p9), %v2404_v7  ;;  %1027 = vmatprep.subr.bf16.mxu1 (!%p193_p9), %v2405_v8  ;;  %v2422_v19 = vld [vmem:[%s3392_s1 + $0x140] ss:$8 sps:$4 sm:$0xff] (!%p193_p9)   ;;  %v2425_v21 = vld [vmem:[%s3392_s1 + $0x154] ss:$8 sps:$4 sm:$0xff] (!%p193_p9)   ;;  %v2427_v22 = vld [vmem:[%s3392_s1 + $0x50] ss:$8 sps:$4 sm:$0xff] (!%p193_p9)  }
  0x15   : > { %1140 = vmatprep.subr.bf16.mxu0 %v2407_v9  ;;  %v2428_v23 = vld [vmem:[%s3392_s1 + $0x150] ss:$8 sps:$4 sm:$0xff]   ;;  %v2429_v24 = vld [vmem:[%s3392_s1 + $0x64] ss:$8 sps:$4 sm:$0xff]   ;;  %v2433_v26 = vld [vmem:[%s3392_s1 + $0x60] ss:$8 sps:$4 sm:$0xff]  }
  0x16   : > { %v2431_v25 = vld [vmem:[%s3392_s1 + $0x164] ss:$8 sps:$4 sm:$0xff]   ;;  %v2434_v27 = vld [vmem:[%s3392_s1 + $0x160] ss:$8 sps:$4 sm:$0xff]   ;;  %v2435_v28 = vld [vmem:[%s3392_s1 + $0x74] ss:$8 sps:$4 sm:$0xff]  }
  0x17   : > { %1028 = vmatpush1.bf16.msra.mxu1 %v2409_v10  ;;  %v2437_v29 = vld [vmem:[%s3392_s1 + $0x174] ss:$8 sps:$4 sm:$0xff]   ;;  %v2439_v30 = vld [vmem:[%s3392_s1 + $0x70] ss:$8 sps:$4 sm:$0xff]   ;;  %p222_p10 = scmp.lt.s32.totalorder %s1916_s15, 31  ;;  %vm998_vm0 = vcmask 130048  }
  0x18   : > { %1141 = vmatpush1.bf16.msra.mxu0 %v2410_v11  ;;  %1029 = vmatprep.subr.bf16.mxu1 %v2411_v12  ;;  %v2440_v31 = vld [vmem:[%s3392_s1 + $0x170] ss:$8 sps:$4 sm:$0xff]   ;;  %v2441_v32 = vld [vmem:[%s3392_s1 + $0x84] ss:$8 sps:$4 sm:$0xff]   ;;  %v2445_v34 = vld [vmem:[%s3392_s1 + $0x80] ss:$8 sps:$4 sm:$0xff]  }
  0x19   : > { %1142 = vmatprep.subr.bf16.mxu0 %v2413_v13  ;;  %v2443_v33 = vld [vmem:[%s3392_s1 + $0x184] ss:$8 sps:$4 sm:$0xff]   ;;  %v2446_v35 = vld [vmem:[%s3392_s1 + $0x180] ss:$8 sps:$4 sm:$0xff]   ;;  %s3404_s15 = smov (!%p222_p10, %s1916_s15), 31  ;;  %s218_s8 = sand.u32 1, %s2610_s19  }
  0x1a   : > { %v2447_v36 = vld [vmem:[%s3392_s1 + $0x94] ss:$8 sps:$4 sm:$0xff]   ;;  %v2451_v38 = vld [vmem:[%s3392_s1 + $0x90] ss:$8 sps:$4 sm:$0xff]   ;;  %s2350_s30 = smul.u32 56, %s3404_s15  ;;  %s1915_s11 = sshll.u32 %s218_s8, 6 }
  0x1b   : > { %1030 = vmatpush1.bf16.msra.mxu1 %v2415_v14  ;;  %v2449_v37 = vld [vmem:[%s3392_s1 + $0x194] ss:$8 sps:$4 sm:$0xff]   ;;  %v2452_v39 = vld [vmem:[%s3392_s1 + $0x190] ss:$8 sps:$4 sm:$0xff]   ;;  %v2453_v40 = vld [vmem:[%s3392_s1 + $0xa4] ss:$8 sps:$4 sm:$0xff]  }
  0x1c   : > { %1143 = vmatpush1.bf16.msra.mxu0 %v2416_v15  ;;  %1031 = vmatprep.subr.bf16.mxu1 %v2417_v16  ;;  %v2455_v41 = vld [vmem:[%s3392_s1 + $0x1a4] ss:$8 sps:$4 sm:$0xff]   ;;  %v2457_v42 = vld [vmem:[%s3392_s1 + $0xa0] ss:$8 sps:$4 sm:$0xff]   ;;  %s2838_s23 = scalar_lea.vmem %s3391_s0, %s2350_s30  ;;  %v2459_v44 = vld [vmem:[%s3392_s1 + $0xb4] ss:$8 sps:$4 sm:$0xff]  }
  0x1d   : > { %1144 = vmatprep.subr.bf16.mxu0 %v2419_v17  ;;  %v2458_v43 = vld [vmem:[%s3392_s1 + $0x1a0] ss:$8 sps:$4 sm:$0xff]   ;;  %v2461_v45 = vld [vmem:[%s3392_s1 + $0x1b4] ss:$8 sps:$4 sm:$0xff]   ;;  %v2463_v50 = vld [vmem:[%s3392_s1 + $0xb0] ss:$8 sps:$4 sm:$0xff]  }
  0x1e   : > { %v231_v46 = vld [vmem:[%s2838_s23 + $0x8] sm:$0xff]  ;;  %v238_v47 = vld [vmem:[%s2838_s23 + $0x40] sm:$0xff]  ;;  %v233_v48 = vld [vmem:[%s2838_s23 + $0x18] sm:$0xff]  ;;  %s3315_s12 = scalar_lea.vmem [#allocation2], %s1915_s11  ;;  %s3350_s17 = scalar_lea.sflag [#allocation3], %s218_s8 }
  0x1f   : > { %1032 = vmatpush1.bf16.msra.mxu1 %v2421_v18  ;;  %v240_v49 = vld [vmem:[%s2838_s23 + $0x50] sm:$0xff]  ;;  %v2465_v52 = vld [vmem:[%s3392_s1 + $0xc4] ss:$8 sps:$4 sm:$0xff]   ;;  %v343_v53 = vpack.c.bf16 %v238_v47, %v231_v46  ;;  %v2469_v56 = vld [vmem:[%s3392_s1 + $0xc0] ss:$8 sps:$4 sm:$0xff]   ;;  %s1849_s13 = sshll.u32 %s3315_s12, 4  ;;  %s3345_s13 = int_to_ptr.vmem [resolvable:$true] %s1849_s13 }
  0x20   : > { %1145 = vmatpush1.bf16.msra.mxu0 %v2422_v19  ;;  %1033 = vmatprep.subr.bf16.mxu1 %v2423_v20  ;;  %v2464_v51 = vld [vmem:[%s3392_s1 + $0x1b0] ss:$8 sps:$4 sm:$0xff]   ;;  %v345_v54 = vpack.c.bf16 %v240_v49, %v233_v48  ;;  %v2467_v55 = vld [vmem:[%s3392_s1 + $0x1c4] ss:$8 sps:$4 sm:$0xff]   ;;  %v2470_v57 = vld [vmem:[%s3392_s1 + $0x1c0] ss:$8 sps:$4 sm:$0xff]  }
  0x21   : > { %1146 = vmatprep.subr.bf16.mxu0 %v2425_v21  ;;  %1055 = vmatprep.mubr.bf16.mxu1 %v343_v53  ;;  %v2471_v58 = vld [vmem:[%s3392_s1 + $0xd4] ss:$8 sps:$4 sm:$0xff]   ;;  %v2475_v60 = vld [vmem:[%s3392_s1 + $0xd0] ss:$8 sps:$4 sm:$0xff]   ;;  %v2477_v62 = vld [vmem:[%s3392_s1 + $0xe4] ss:$8 sps:$4 sm:$0xff]  }
  0x22   : > { %1168 = vmatprep.mubr.bf16.mxu0 %v345_v54  ;;  %v2473_v59 = vld [vmem:[%s3392_s1 + $0x1d4] ss:$8 sps:$4 sm:$0xff]   ;;  %v2476_v61 = vld [vmem:[%s3392_s1 + $0x1d0] ss:$8 sps:$4 sm:$0xff]   ;;  %v2479_v63 = vld [vmem:[%s3392_s1 + $0x1e4] ss:$8 sps:$4 sm:$0xff]  }
  0x23   : > { %1034 = vmatpush1.bf16.msra.mxu1 %v2427_v22  ;;  %v2481_v0 = vld [vmem:[%s3392_s1 + $0xe0] ss:$8 sps:$4 sm:$0xff]   ;;  %v2483_v2 = vld [vmem:[%s3392_s1 + $0xf4] ss:$8 sps:$4 sm:$0xff]   ;;  %v2487_v4 = vld [vmem:[%s3392_s1 + $0xf0] ss:$8 sps:$4 sm:$0xff]  }
  0x24   : > { %1147 = vmatpush1.bf16.msra.mxu0 %v2428_v23  ;;  %1035 = vmatprep.subr.bf16.mxu1 %v2429_v24  ;;  %v2482_v1 = vld [vmem:[%s3392_s1 + $0x1e0] ss:$8 sps:$4 sm:$0xff]   ;;  %v2485_v3 = vld [vmem:[%s3392_s1 + $0x1f4] ss:$8 sps:$4 sm:$0xff]   ;;  %v2488_v5 = vld [vmem:[%s3392_s1 + $0x1f0] ss:$8 sps:$4 sm:$0xff]  }
  0x25   : > { %1148 = vmatprep.subr.bf16.mxu0 %v2431_v25  ;;  %v230_v6 = vld [vmem:[%s2838_s23] sm:$0xff]  ;;  %v237_v7 = vld [vmem:[%s2838_s23 + $0x38] sm:$0xff]  ;;  %v232_v8 = vld [vmem:[%s2838_s23 + $0x10] sm:$0xff]  ;;  %s2621_s25 = smov [#allocation2]  }
  0x26   : > { %v239_v9 = vld [vmem:[%s2838_s23 + $0x48] sm:$0xff]  ;;  %v245_v11 = vld [vmem:[%s2838_s23 + $0x78] sm:$0xff]  ;;  %v252_v12 = vld [vmem:[%s2838_s23 + $0xb0] sm:$0xff]  ;;  %v342_v13 = vpack.c.bf16 %v237_v7, %v230_v6  ;;  %s2560_s26 = sshll.u32 %s2621_s25, 4  ;;  %s2561_s26 = int_to_ptr.vmem [resolvable:$false] %s2560_s26 }
  0x27   : > { %1036 = vmatpush1.bf16.msra.mxu1 %v2433_v26  ;;  %v2491_v10 = vld [vmem:[%s3392_s1 + $0x204] ss:$8 sps:$4 sm:$0xff]   ;;  %v344_v14 = vpack.c.bf16 %v239_v9, %v232_v8  ;;  %v2489_v17 = vld [vmem:[%s3392_s1 + $0x200] ss:$8 sps:$4 sm:$0xff]   ;;  %v2494_v18 = vld [vmem:[%s3392_s1 + $0x214] ss:$8 sps:$4 sm:$0xff]   ;;  %v350_v20 = vpack.c.bf16 %v252_v12, %v245_v11  ;;  %p2563_p0 = scmp.lt.s32.totalorder %s3345_s13, %s2561_s26 }
  0x28   : > { %1149 = vmatpush1.bf16.msra.mxu0 %v2434_v27  ;;  %1037 = vmatprep.subr.bf16.mxu1 %v2435_v28  ;;  %v247_v15 = vld [vmem:[%s2838_s23 + $0x88] sm:$0xff]  ;;  %v254_v16 = vld [vmem:[%s2838_s23 + $0xc0] sm:$0xff]  ;;  %v2492_v19 = vld [vmem:[%s3392_s1 + $0x210] ss:$8 sps:$4 sm:$0xff]   ;;  %s2562_s6 = scalar_lea.vmem %s2561_s26, 2048 }
  0x29   : > { %1150 = vmatprep.subr.bf16.mxu0 %v2437_v29  ;;  %v352_v21 = vpack.c.bf16 %v254_v16, %v247_v15  ;;  %v244_v22 = vld [vmem:[%s2838_s23 + $0x70] sm:$0xff]  ;;  %v251_v23 = vld [vmem:[%s2838_s23 + $0xa8] sm:$0xff]  ;;  %v246_v24 = vld [vmem:[%s2838_s23 + $0x80] sm:$0xff] }
  0x2a   : > { %v253_v25 = vld [vmem:[%s2838_s23 + $0xb8] sm:$0xff]  ;;  %v2497_v26 = vld [vmem:[%s3392_s1 + $0x224] ss:$8 sps:$4 sm:$0xff]   ;;  %v349_v28 = vpack.c.bf16 %v251_v23, %v244_v22  ;;  %v2501_v49 = vld [vmem:[%s3392_s1 + $0x240] ss:$8 sps:$4 sm:$0xff]  }
  0x2b   : > { %1038 = vmatpush1.bf16.msra.mxu1 %v2439_v30  ;;  %v259_v27 = vld [vmem:[%s2838_s23 + $0xe8] sm:$0xff]  ;;  %v351_v29 = vpack.c.bf16 %v253_v25, %v246_v24  ;;  %v266_v30 = vld [vmem:[%s2838_s23 + $0x120] sm:$0xff]  ;;  %v272_v54 = vld [vmem:[%s2838_s23 + $0x150] sm:$0xff] }
  0x2c   : > { %1151 = vmatpush1.bf16.msra.mxu0 %v2440_v31  ;;  %1039 = vmatprep.subr.bf16.mxu1 %v2441_v32  ;;  %v261_v31 = vld [vmem:[%s2838_s23 + $0xf8] sm:$0xff]  ;;  %v268_v32 = vld [vmem:[%s2838_s23 + $0x130] sm:$0xff]  ;;  %v275_v47 = vld [vmem:[%s2838_s23 + $0x168] sm:$0xff] }
  0x2d   : > { %1152 = vmatprep.subr.bf16.mxu0 %v2443_v33  ;;  %v2495_v33 = vld [vmem:[%s3392_s1 + $0x220] ss:$8 sps:$4 sm:$0xff]   ;;  %v293_v7 = vld [vmem:[%s2838_s23 + $0x1f8] sm:$0xff]  ;;  %v288_v8 = vld [vmem:[%s2838_s23 + $0x1d0] sm:$0xff] }
  0x2e   : > { %v282_v48 = vld [vmem:[%s2838_s23 + $0x1a0] sm:$0xff]  ;;  %v295_v9 = vld [vmem:[%s2838_s23 + $0x208] sm:$0xff]  ;;  %v301_v11 = vld [vmem:[%s2838_s23 + $0x238] sm:$0xff] }
  0x2f   : > { %1040 = vmatpush1.bf16.msra.mxu1 %v2445_v34  ;;  %v2500_v34 = vld [vmem:[%s3392_s1 + $0x234] ss:$8 sps:$4 sm:$0xff]   ;;  %v366_v53 = vpack.c.bf16 %v282_v48, %v275_v47  ;;  %v286_v6 = vld [vmem:[%s2838_s23 + $0x1c0] sm:$0xff]  ;;  %v303_v15 = vld [vmem:[%s2838_s23 + $0x248] sm:$0xff] }
  0x30   : > { %1153 = vmatpush1.bf16.msra.mxu0 %v2446_v35  ;;  %1041 = vmatprep.subr.bf16.mxu1 %v2447_v36  ;;  %v357_v35 = vpack.c.bf16 %v266_v30, %v259_v27  ;;  %v359_v36 = vpack.c.bf16 %v268_v32, %v261_v31  ;;  %v370_v12 = vpack.c.bf16 %v293_v7, %v286_v6  ;;  %v310_v16 = vld [vmem:[%s2838_s23 + $0x280] sm:$0xff]  ;;  %v300_v22 = vld [vmem:[%s2838_s23 + $0x230] sm:$0xff]  ;;  %v307_v23 = vld [vmem:[%s2838_s23 + $0x268] sm:$0xff] }
  0x31   : > { %1154 = vmatprep.subr.bf16.mxu0 %v2449_v37  ;;  %v2498_v37 = vld [vmem:[%s3392_s1 + $0x230] ss:$8 sps:$4 sm:$0xff]   ;;  %v302_v24 = vld [vmem:[%s2838_s23 + $0x240] sm:$0xff]  ;;  %v315_v27 = vld [vmem:[%s2838_s23 + $0x2a8] sm:$0xff]  ;;  %v377_v32 = vpack.c.bf16 %v307_v23, %v300_v22 }
  0x32   : > { %v309_v25 = vld [vmem:[%s2838_s23 + $0x278] sm:$0xff]  ;;  %v324_v31 = vld [vmem:[%s2838_s23 + $0x2f0] sm:$0xff]  ;;  %v2525_v47 = vld [vmem:[%s3392_s1 + $0x2c0] ss:$8 sps:$4 sm:$0xff]  }
  0x33   : > { %1042 = vmatpush1.bf16.msra.mxu1 %v2451_v38  ;;  %v258_v38 = vld [vmem:[%s2838_s23 + $0xe0] sm:$0xff]  ;;  %v317_v30 = vld [vmem:[%s2838_s23 + $0x2b8] sm:$0xff]  ;;  %v304_v22 = vld [vmem:[%s2838_s23 + $0x250] sm:$0xff] }
  0x34   : > { %1155 = vmatpush1.bf16.msra.mxu0 %v2452_v39  ;;  %1043 = vmatprep.subr.bf16.mxu1 %v2453_v40  ;;  %v265_v39 = vld [vmem:[%s2838_s23 + $0x118] sm:$0xff]  ;;  %v260_v40 = vld [vmem:[%s2838_s23 + $0xf0] sm:$0xff]  ;;  %v234_v6 = vld [vmem:[%s2838_s23 + $0x20] sm:$0xff] }
  0x35   : > { %1156 = vmatprep.subr.bf16.mxu0 %v2455_v41  ;;  %v267_v41 = vld [vmem:[%s2838_s23 + $0x128] sm:$0xff]  ;;  %v241_v7 = vld [vmem:[%s2838_s23 + $0x58] sm:$0xff] }
  0x36   : > { %v358_v46 = vpack.c.bf16 %v267_v41, %v260_v40  ;;  %v316_v40 = vld [vmem:[%s2838_s23 + $0x2b0] sm:$0xff]  ;;  %v323_v41 = vld [vmem:[%s2838_s23 + $0x2e8] sm:$0xff] }
  0x37   : > { %1044 = vmatpush1.bf16.msra.mxu1 %v2457_v42  ;;  %v2503_v42 = vld [vmem:[%s3392_s1 + $0x244] ss:$8 sps:$4 sm:$0xff]  }
  0x38   : > { %1157 = vmatpush1.bf16.msra.mxu0 %v2458_v43  ;;  %1045 = vmatprep.subr.bf16.mxu1 %v2459_v44  ;;  %v273_v43 = vld [vmem:[%s2838_s23 + $0x158] sm:$0xff]  ;;  %v280_v44 = vld [vmem:[%s2838_s23 + $0x190] sm:$0xff]  ;;  %v311_v23 = vld [vmem:[%s2838_s23 + $0x288] sm:$0xff] }
  0x39   : > { %1158 = vmatprep.subr.bf16.mxu0 %v2461_v45  ;;  %v356_v45 = vpack.c.bf16 %v265_v39, %v258_v38  ;;  %v314_v38 = vld [vmem:[%s2838_s23 + $0x2a0] sm:$0xff]  ;;  %v321_v39 = vld [vmem:[%s2838_s23 + $0x2d8] sm:$0xff] }
  0x3a   : > { %v384_v48 = vpack.c.bf16 %v321_v39, %v314_v38  ;;  %v333_v38 = vld [vmem:[%s2838_s23 + $0x338] sm:$0xff]  ;;  %v340_v39 = vld [vmem:[%s2838_s23 + $0x370] sm:$0xff] }
  0x3b   : > { %1046 = vmatpush1.bf16.msra.mxu1 %v2463_v50  ;;  %v2506_v50 = vld [vmem:[%s3392_s1 + $0x254] ss:$8 sps:$4 sm:$0xff]  }
  0x3c   : > { %1159 = vmatpush1.bf16.msra.mxu0 %v2464_v51  ;;  %1047 = vmatprep.subr.bf16.mxu1 %v2465_v52  ;;  %v2504_v51 = vld [vmem:[%s3392_s1 + $0x250] ss:$8 sps:$4 sm:$0xff]   ;;  %v364_v52 = vpack.c.bf16 %v280_v44, %v273_v43 }
  0x3d   : > { %1160 = vmatprep.subr.bf16.mxu0 %v2467_v55  ;;  %v279_v55 = vld [vmem:[%s2838_s23 + $0x188] sm:$0xff]  ;;  %v329_v43 = vld [vmem:[%s2838_s23 + $0x318] sm:$0xff]  ;;  %v336_v44 = vld [vmem:[%s2838_s23 + $0x350] sm:$0xff] }
  0x3f   : > { %1048 = vmatpush1.bf16.msra.mxu1 %v2469_v56  ;;  %v274_v56 = vld [vmem:[%s2838_s23 + $0x160] sm:$0xff] }
  0x40   : > { %1161 = vmatpush1.bf16.msra.mxu0 %v2470_v57  ;;  %1049 = vmatprep.subr.bf16.mxu1 %v2471_v58  ;;  %v281_v57 = vld [vmem:[%s2838_s23 + $0x198] sm:$0xff]  ;;  %v2509_v58 = vld [vmem:[%s3392_s1 + $0x264] ss:$8 sps:$4 sm:$0xff]  }
  0x41   : > { %1162 = vmatprep.subr.bf16.mxu0 %v2473_v59  ;;  %v287_v59 = vld [vmem:[%s2838_s23 + $0x1c8] sm:$0xff] }
  0x43   : > { %1050 = vmatpush1.bf16.msra.mxu1 %v2475_v60  ;;  %v363_v60 = vpack.c.bf16 %v279_v55, %v272_v54  ;;  %v328_v54 = vld [vmem:[%s2838_s23 + $0x310] sm:$0xff]  ;;  %v335_v55 = vld [vmem:[%s2838_s23 + $0x348] sm:$0xff] }
  0x44   : > { %1163 = vmatpush1.bf16.msra.mxu0 %v2476_v61  ;;  %1051 = vmatprep.subr.bf16.mxu1 %v2477_v62  ;;  %v365_v61 = vpack.c.bf16 %v281_v57, %v274_v56  ;;  %v294_v62 = vld [vmem:[%s2838_s23 + $0x200] sm:$0xff]  ;;  %v337_v57 = vld [vmem:[%s2838_s23 + $0x358] sm:$0xff] }
  0x45   : > { %1164 = vmatprep.subr.bf16.mxu0 %v2479_v63  ;;  %v289_v63 = vld [vmem:[%s2838_s23 + $0x1d8] sm:$0xff]  ;;  %v330_v56 = vld [vmem:[%s2838_s23 + $0x320] sm:$0xff] }
  0x47   : > { %1052 = vmatpush1.bf16.msra.mxu1 %v2481_v0  ;;  %v296_v0 = vld [vmem:[%s2838_s23 + $0x210] sm:$0xff] }
  0x48   : > { %1165 = vmatpush1.bf16.msra.mxu0 %v2482_v1  ;;  %1053 = vmatprep.subr.bf16.mxu1 %v2483_v2  ;;  %v2507_v1 = vld [vmem:[%s3392_s1 + $0x260] ss:$8 sps:$4 sm:$0xff]   ;;  %v2512_v2 = vld [vmem:[%s3392_s1 + $0x274] ss:$8 sps:$4 sm:$0xff]  }
  0x49   : > { %1166 = vmatprep.subr.bf16.mxu0 %v2485_v3  ;;  %v371_v3 = vpack.c.bf16 %v294_v62, %v287_v59  ;;  %v235_v59 = vld [vmem:[%s2838_s23 + $0x28] sm:$0xff]  ;;  %v242_v62 = vld [vmem:[%s2838_s23 + $0x60] sm:$0xff] }
  0x4b   : > { %1054 = vmatpush1.bf16.msra.mxu1 %v2487_v4  ;;  %v373_v4 = vpack.c.bf16 %v296_v0, %v289_v63  ;;  %v291_v63 = vld [vmem:[%s2838_s23 + $0x1e8] sm:$0xff]  ;;  %v298_v0 = vld [vmem:[%s2838_s23 + $0x220] sm:$0xff] }
  0x4c   : > { %1167 = vmatpush1.bf16.msra.mxu0 %v2488_v5  ;;  %2190 = vmatprep.subr.bf16.mxu1 %v2491_v10  ;;  %v2510_v5 = vld [vmem:[%s3392_s1 + $0x270] ss:$8 sps:$4 sm:$0xff]  }
  0x4d   : > { %1249 = vmatprep.subr.bf16.mxu0 %v2491_v10  ;;  %v2515_v10 = vld [vmem:[%s3392_s1 + $0x284] ss:$8 sps:$4 sm:$0xff]  }
  0x4e   : > { %1056 = vmatmul.mubr.bf16.vlgmr.msra.gmra.mrb[0].mxu1 %v342_v13  ;;  %v372_v13 = vpack.c.bf16 %v295_v9, %v288_v8  ;;  %v290_v8 = vld [vmem:[%s2838_s23 + $0x1e0] sm:$0xff]  ;;  %v297_v9 = vld [vmem:[%s2838_s23 + $0x218] sm:$0xff] }
  0x4f   : > { %1169 = vmatmul.mubr.bf16.vlgmr.msra.gmra.mrb[0].mxu0 %v344_v14  ;;  %2206 = vmatpush1.bf16.msra.mxu1 %v2489_v17  ;;  %v308_v14 = vld [vmem:[%s2838_s23 + $0x270] sm:$0xff] }
  0x50   : > { %1250 = vmatpush1.bf16.msra.mxu0 %v2489_v17  ;;  %2191 = vmatprep.subr.bf16.mxu1 %v2494_v18  ;;  %v2513_v17 = vld [vmem:[%s3392_s1 + $0x280] ss:$8 sps:$4 sm:$0xff]  }
  0x51   : > { %1251 = vmatprep.subr.bf16.mxu0 %v2494_v18  ;;  %1065 = vmatprep.mubr.bf16.mxu1 %v350_v20  ;;  %v2518_v18 = vld [vmem:[%s3392_s1 + $0x294] ss:$8 sps:$4 sm:$0xff]   ;;  %v380_v20 = vpack.c.bf16 %v310_v16, %v303_v15  ;;  %v346_v15 = vpack.c.bf16 %v241_v7, %v234_v6  ;;  %v374_v16 = vpack.c.bf16 %v297_v9, %v290_v8  ;;  %v327_v6 = vld [vmem:[%s2838_s23 + $0x308] sm:$0xff]  ;;  %v334_v8 = vld [vmem:[%s2838_s23 + $0x340] sm:$0xff] }
  0x52   : > { %1178 = vmatprep.mubr.bf16.mxu0 %v352_v21  ;;  %v2516_v21 = vld [vmem:[%s3392_s1 + $0x290] ss:$8 sps:$4 sm:$0xff]  }
  0x53   : > { %2207 = vmatpush1.bf16.msra.mxu1 %v2492_v19  ;;  %v341_v9 = vld [vmem:[%s2838_s23 + $0x378] sm:$0xff] }
  0x54   : > { %1252 = vmatpush1.bf16.msra.mxu0 %v2492_v19  ;;  %2192 = vmatprep.subr.bf16.mxu1 %v2497_v26  ;;  %v378_v19 = vpack.c.bf16 %v308_v14, %v301_v11  ;;  %v249_v11 = vld [vmem:[%s2838_s23 + $0x98] sm:$0xff]  ;;  %v312_v14 = vld [vmem:[%s2838_s23 + $0x290] sm:$0xff] }
  0x55   : > { %1253 = vmatprep.subr.bf16.mxu0 %v2497_v26  ;;  %v2521_v26 = vld [vmem:[%s3392_s1 + $0x2a4] ss:$8 sps:$4 sm:$0xff]  }
  0x56   : > { %1066 = vmatmul.mubr.bf16.gmra.mrb[4].mxu1 %v349_v28  ;;  %v2519_v28 = vld [vmem:[%s3392_s1 + $0x2a0] ss:$8 sps:$4 sm:$0xff]  }
  0x57   : > { %1179 = vmatmul.mubr.bf16.gmra.mrb[4].mxu0 %v351_v29  ;;  %2208 = vmatpush1.bf16.msra.mxu1 %v2495_v33  ;;  %v322_v29 = vld [vmem:[%s2838_s23 + $0x2e0] sm:$0xff] }
  0x58   : > { %1254 = vmatpush1.bf16.msra.mxu0 %v2495_v33  ;;  %2193 = vmatprep.subr.bf16.mxu1 %v2500_v34  ;;  %v379_v33 = vpack.c.bf16 %v309_v25, %v302_v24  ;;  %v263_v24 = vld [vmem:[%s2838_s23 + $0x108] sm:$0xff]  ;;  %v270_v25 = vld [vmem:[%s2838_s23 + $0x140] sm:$0xff] }
  0x59   : > { %1255 = vmatprep.subr.bf16.mxu0 %v2500_v34  ;;  %1075 = vmatprep.mubr.bf16.mxu1 %v357_v35  ;;  %v2524_v34 = vld [vmem:[%s3392_s1 + $0x2b4] ss:$8 sps:$4 sm:$0xff]   ;;  %v2522_v35 = vld [vmem:[%s3392_s1 + $0x2b0] ss:$8 sps:$4 sm:$0xff]  }
  0x5a   : > { %1188 = vmatprep.mubr.bf16.mxu0 %v359_v36  ;;  %v385_v36 = vpack.c.bf16 %v322_v29, %v315_v27  ;;  %v326_v27 = vld [vmem:[%s2838_s23 + $0x300] sm:$0xff]  ;;  %v381_v29 = vpack.c.bf16 %v311_v23, %v304_v22  ;;  %v2551_v22 = vld [vmem:[%s3394_s3 + $0x28] sm:$0xff]   ;;  %v2552_v23 = vld [vmem:[%s3394_s3 + $0x70] sm:$0xff]  }
  0x5b   : > { %2209 = vmatpush1.bf16.msra.mxu1 %v2498_v37 }
  0x5c   : > { %1256 = vmatpush1.bf16.msra.mxu0 %v2498_v37  ;;  %2194 = vmatprep.subr.bf16.mxu1 %v2503_v42  ;;  %v387_v37 = vpack.c.bf16 %v324_v31, %v317_v30  ;;  %v361_v30 = vpack.c.bf16 %v270_v25, %v263_v24  ;;  %v2553_v24 = vld [vmem:[%s3394_s3 + $0x30] sm:$0xff]   ;;  %v2554_v25 = vld [vmem:[%s3394_s3 + $0x78] sm:$0xff]  }
  0x5d   : > { %1257 = vmatprep.subr.bf16.mxu0 %v2503_v42  ;;  %v2527_v42 = vld [vmem:[%s3392_s1 + $0x2c4] ss:$8 sps:$4 sm:$0xff]  }
  0x5e   : > { %1076 = vmatmul.mubr.bf16.gmra.mrb[8].mxu1 %v356_v45  ;;  %v331_v45 = vld [vmem:[%s2838_s23 + $0x328] sm:$0xff] }
  0x5f   : > { %1189 = vmatmul.mubr.bf16.gmra.mrb[8].mxu0 %v358_v46  ;;  %2210 = vmatpush1.bf16.msra.mxu1 %v2501_v49  ;;  %v338_v46 = vld [vmem:[%s2838_s23 + $0x360] sm:$0xff] }
  0x60   : > { %1258 = vmatpush1.bf16.msra.mxu0 %v2501_v49  ;;  %2195 = vmatprep.subr.bf16.mxu1 %v2506_v50  ;;  %v386_v49 = vpack.c.bf16 %v323_v41, %v316_v40 }
  0x61   : > { %1259 = vmatprep.subr.bf16.mxu0 %v2506_v50  ;;  %1085 = vmatprep.mubr.bf16.mxu1 %v364_v52  ;;  %v2530_v50 = vld [vmem:[%s3392_s1 + $0x2d4] ss:$8 sps:$4 sm:$0xff]   ;;  %v394_v52 = vpack.c.bf16 %v338_v46, %v331_v45  ;;  %v283_v45 = vld [vmem:[%s2838_s23 + $0x1a8] sm:$0xff] }
  0x62   : > { %1198 = vmatprep.mubr.bf16.mxu0 %v366_v53  ;;  %v2528_v53 = vld [vmem:[%s3392_s1 + $0x2d0] ss:$8 sps:$4 sm:$0xff]  }
  0x63   : > { %2211 = vmatpush1.bf16.msra.mxu1 %v2504_v51  ;;  %v332_v46 = vld [vmem:[%s2838_s23 + $0x330] sm:$0xff] }
  0x64   : > { %1260 = vmatpush1.bf16.msra.mxu0 %v2504_v51  ;;  %2196 = vmatprep.subr.bf16.mxu1 %v2509_v58  ;;  %v392_v51 = vpack.c.bf16 %v336_v44, %v329_v43  ;;  %v396_v43 = vpack.c.bf16 %v340_v39, %v333_v38  ;;  %v276_v44 = vld [vmem:[%s2838_s23 + $0x170] sm:$0xff] }
  0x65   : > { %1261 = vmatprep.subr.bf16.mxu0 %v2509_v58  ;;  %v2533_v58 = vld [vmem:[%s3392_s1 + $0x2e4] ss:$8 sps:$4 sm:$0xff]  }
  0x66   : > { %1086 = vmatmul.mubr.bf16.gmra.mrb[12].mxu1 %v363_v60  ;;  %v391_v60 = vpack.c.bf16 %v335_v55, %v328_v54  ;;  %v250_v54 = vld [vmem:[%s2838_s23 + $0xa0] sm:$0xff]  ;;  %v257_v55 = vld [vmem:[%s2838_s23 + $0xd8] sm:$0xff] }
  0x67   : > { %1199 = vmatmul.mubr.bf16.gmra.mrb[12].mxu0 %v365_v61  ;;  %2212 = vmatpush1.bf16.msra.mxu1 %v2507_v1  ;;  %v393_v61 = vpack.c.bf16 %v337_v57, %v330_v56  ;;  %v355_v56 = vpack.c.bf16 %v257_v55, %v250_v54  ;;  %v264_v57 = vld [vmem:[%s2838_s23 + $0x110] sm:$0xff] }
  0x68   : > { %1262 = vmatpush1.bf16.msra.mxu0 %v2507_v1  ;;  %2197 = vmatprep.subr.bf16.mxu1 %v2512_v2  ;;  %v2531_v1 = vld [vmem:[%s3392_s1 + $0x2e0] ss:$8 sps:$4 sm:$0xff]  }
  0x69   : > { %1263 = vmatprep.subr.bf16.mxu0 %v2512_v2  ;;  %1095 = vmatprep.mubr.bf16.mxu1 %v371_v3  ;;  %v2536_v2 = vld [vmem:[%s3392_s1 + $0x2f4] ss:$8 sps:$4 sm:$0xff]   ;;  %v347_v3 = vpack.c.bf16 %v242_v62, %v235_v59 }
  0x6a   : > { %1208 = vmatprep.mubr.bf16.mxu0 %v373_v4  ;;  %v375_v4 = vpack.c.bf16 %v298_v0, %v291_v63  ;;  %v292_v63 = vld [vmem:[%s2838_s23 + $0x1f0] sm:$0xff]  ;;  %v299_v0 = vld [vmem:[%s2838_s23 + $0x228] sm:$0xff] }
  0x6b   : > { %2213 = vmatpush1.bf16.msra.mxu1 %v2510_v5 }
  0x6c   : > { %1264 = vmatpush1.bf16.msra.mxu0 %v2510_v5  ;;  %2198 = vmatprep.subr.bf16.mxu1 %v2515_v10  ;;  %v2534_v5 = vld [vmem:[%s3392_s1 + $0x2f0] ss:$8 sps:$4 sm:$0xff]  }
  0x6d   : > { %1265 = vmatprep.subr.bf16.mxu0 %v2515_v10  ;;  %v2539_v10 = vld [vmem:[%s3392_s1 + $0x304] ss:$8 sps:$4 sm:$0xff]  }
  0x6e   : > { %1096 = vmatmul.mubr.bf16.gmra.mrb[16].mxu1 %v370_v12  ;;  %v256_v12 = vld [vmem:[%s2838_s23 + $0xd0] sm:$0xff] }
  0x6f   : > { %1209 = vmatmul.mubr.bf16.gmra.mrb[16].mxu0 %v372_v13  ;;  %2214 = vmatpush1.bf16.msra.mxu1 %v2513_v17  ;;  %v305_v13 = vld [vmem:[%s2838_s23 + $0x258] sm:$0xff] }
  0x70   : > { %1266 = vmatpush1.bf16.msra.mxu0 %v2513_v17  ;;  %2199 = vmatprep.subr.bf16.mxu1 %v2518_v18  ;;  %v2537_v17 = vld [vmem:[%s3392_s1 + $0x300] ss:$8 sps:$4 sm:$0xff]  }
  0x71   : > { %1267 = vmatprep.subr.bf16.mxu0 %v2518_v18  ;;  %1105 = vmatprep.mubr.bf16.mxu1 %v378_v19  ;;  %v354_v18 = vpack.c.bf16 %v256_v12, %v249_v11  ;;  %v382_v19 = vpack.c.bf16 %v312_v14, %v305_v13  ;;  %v2540_v11 = vld [vmem:[%s3394_s3 + $0x40] sm:$0xff]   ;;  %v2542_v13 = vld [vmem:[%s3394_s3 + $0x48] sm:$0xff]  }
  0x72   : > { %1218 = vmatprep.mubr.bf16.mxu0 %v380_v20  ;;  %v248_v20 = vld [vmem:[%s2838_s23 + $0x90] sm:$0xff]  ;;  %v2541_v12 = vld [vmem:[%s3394_s3] sm:$0xff]   ;;  %v2543_v14 = vld [vmem:[%s3394_s3 + $0x8] sm:$0xff]  }
  0x73   : > { %2215 = vmatpush1.bf16.msra.mxu1 %v2516_v21 }
  0x74   : > { %1268 = vmatpush1.bf16.msra.mxu0 %v2516_v21  ;;  %2200 = vmatprep.subr.bf16.mxu1 %v2521_v26  ;;  %v255_v21 = vld [vmem:[%s2838_s23 + $0xc8] sm:$0xff] }
  0x75   : > { %1269 = vmatprep.subr.bf16.mxu0 %v2521_v26  ;;  %v319_v26 = vld [vmem:[%s2838_s23 + $0x2c8] sm:$0xff] }
  0x76   : > { %1106 = vmatmul.mubr.bf16.gmra.mrb[20].mxu1 %v377_v32  ;;  %v389_v31 = vpack.c.bf16 %v326_v27, %v319_v26  ;;  %v262_v32 = vld [vmem:[%s2838_s23 + $0x100] sm:$0xff]  ;;  %v2555_v26 = vld [vmem:[%s3394_s3 + $0x38] sm:$0xff]  }
  0x77   : > { %1219 = vmatmul.mubr.bf16.gmra.mrb[20].mxu0 %v379_v33  ;;  %2216 = vmatpush1.bf16.msra.mxu1 %v2519_v28  ;;  %v269_v33 = vld [vmem:[%s2838_s23 + $0x138] sm:$0xff] }
  0x78   : > { %1270 = vmatpush1.bf16.msra.mxu0 %v2519_v28  ;;  %2201 = vmatprep.subr.bf16.mxu1 %v2524_v34  ;;  %v353_v28 = vpack.c.bf16 %v255_v21, %v248_v20  ;;  %v360_v40 = vpack.c.bf16 %v269_v33, %v262_v32  ;;  %v2549_v20 = vld [vmem:[%s3394_s3 + $0x20] sm:$0xff]   ;;  %v2550_v21 = vld [vmem:[%s3394_s3 + $0x68] sm:$0xff]  }
  0x79   : > { %1271 = vmatprep.subr.bf16.mxu0 %v2524_v34  ;;  %1115 = vmatprep.mubr.bf16.mxu1 %v385_v36  ;;  %v318_v34 = vld [vmem:[%s2838_s23 + $0x2c0] sm:$0xff]  ;;  %v277_v36 = vld [vmem:[%s2838_s23 + $0x178] sm:$0xff] }
  0x7a   : > { %1228 = vmatprep.mubr.bf16.mxu0 %v387_v37  ;;  %v284_v37 = vld [vmem:[%s2838_s23 + $0x1b0] sm:$0xff] }
  0x7b   : > { %2217 = vmatpush1.bf16.msra.mxu1 %v2522_v35 }
  0x7c   : > { %1272 = vmatpush1.bf16.msra.mxu0 %v2522_v35  ;;  %2202 = vmatprep.subr.bf16.mxu1 %v2527_v42  ;;  %v325_v35 = vld [vmem:[%s2838_s23 + $0x2f8] sm:$0xff] }
  0x7d   : > { %1273 = vmatprep.subr.bf16.mxu0 %v2527_v42  ;;  %v388_v41 = vpack.c.bf16 %v325_v35, %v318_v34  ;;  %v368_v42 = vpack.c.bf16 %v284_v37, %v277_v36  ;;  %v498_v36 = vlaneseq }
  0x7e   : > { %1116 = vmatmul.mubr.bf16.gmra.mrb[24].mxu1 %v384_v48  ;;  %v367_v48 = vpack.c.bf16 %v283_v45, %v276_v44  ;;  %v496_v44 = vld [vmem:[%s3393_s2] sm:$0x3] }
  0x7f   : > { %1229 = vmatmul.mubr.bf16.gmra.mrb[24].mxu0 %v386_v49  ;;  %2218 = vmatpush1.bf16.msra.mxu1 %v2525_v47 }
  0x80   : > { %1274 = vmatpush1.bf16.msra.mxu0 %v2525_v47  ;;  %2203 = vmatprep.subr.bf16.mxu1 %v2530_v50  ;;  %v339_v47 = vld [vmem:[%s2838_s23 + $0x368] sm:$0xff] }
  0x81   : > { %1275 = vmatprep.subr.bf16.mxu0 %v2530_v50  ;;  %1125 = vmatprep.mubr.bf16.mxu1 %v392_v51  ;;  %v395_v49 = vpack.c.bf16 %v339_v47, %v332_v46  ;;  %v2620_v50 = vmov 0   ;;  %v236_v51 = vld [vmem:[%s2838_s23 + $0x30] sm:$0xff] }
  0x82   : > { %1238 = vmatprep.mubr.bf16.mxu0 %v394_v52  ;;  %v243_v52 = vld [vmem:[%s2838_s23 + $0x68] sm:$0xff] }
  0x83   : > { %2219 = vmatpush1.bf16.msra.mxu1 %v2528_v53 }
  0x84   : > { %1276 = vmatpush1.bf16.msra.mxu0 %v2528_v53  ;;  %2204 = vmatprep.subr.bf16.mxu1 %v2533_v58  ;;  %v348_v53 = vpack.c.bf16 %v243_v52, %v236_v51 }
  0x85   : > { %1277 = vmatprep.subr.bf16.mxu0 %v2533_v58  ;;  %v271_v58 = vld [vmem:[%s2838_s23 + $0x148] sm:$0xff] }
  0x86   : > { %1126 = vmatmul.mubr.bf16.gmra.mrb[28].mxu1 %v391_v60  ;;  %v362_v59 = vpack.c.bf16 %v271_v58, %v264_v57  ;;  %v278_v60 = vld [vmem:[%s2838_s23 + $0x180] sm:$0xff] }
  0x87   : > { %1239 = vmatmul.mubr.bf16.gmra.mrb[28].mxu0 %v393_v61  ;;  %2220 = vmatpush1.bf16.msra.mxu1 %v2531_v1  ;;  %v285_v61 = vld [vmem:[%s2838_s23 + $0x1b8] sm:$0xff] }
  0x88   : > { %1278 = vmatpush1.bf16.msra.mxu0 %v2531_v1  ;;  %2205 = vmatprep.subr.bf16.mxu1 %v2536_v2  ;;  %v369_v62 = vpack.c.bf16 %v285_v61, %v278_v60  ;;  %v376_v1 = vpack.c.bf16 %v299_v0, %v292_v63 }
  0x89   : > { %1279 = vmatprep.subr.bf16.mxu0 %v2536_v2  ;;  %1281 = vmatprep.mubr.bf16.mxu0 %v347_v3  ;;  %v306_v2 = vld [vmem:[%s2838_s23 + $0x260] sm:$0xff]  ;;  %v313_v3 = vld [vmem:[%s2838_s23 + $0x298] sm:$0xff] }
  0x8a   : > { %1321 = vmatprep.mubr.bf16.mxu1 %v375_v4  ;;  %v383_v4 = vpack.c.bf16 %v313_v3, %v306_v2 }
  0x8b   : > { %2221 = vmatpush1.bf16.msra.mxu1 %v2534_v5 }
  0x8c   : > { %1280 = vmatpush1.bf16.msra.mxu0 %v2534_v5  ;;  %v320_v5 = vld [vmem:[%s2838_s23 + $0x2d0] sm:$0xff]  ;;  %2126 = vmatprep.subr.bf16.mxu1 %v2540_v11  ;;  %s2078_s23 = sshll.u32 %s2675_s22, 10  ;;  %s2556_s22 = scalar_lea.vmem %s3345_s13, 1024 }
  0x8d   : > { %1362 = vmatprep.subr.bf16.mxu0 %v2539_v10  ;;  %v390_v7 = vpack.c.bf16 %v327_v6, %v320_v5  ;;  %v397_v10 = vpack.c.bf16 %v341_v9, %v334_v8  ;;  %s3343_s16 = scalar_lea.hbm %s3396_s5, %s2078_s23  ;;  %p2557_p11 = scmp.ne.s32.totalorder %s3345_s13, %s2556_s22 }
  0x8e   : > { %1322 = vmatmul.mubr.bf16.vlgmr.msra.gmra.mrb[32].mxu1 %v374_v16  ;;  %v2545_v16 = vld [vmem:[%s3394_s3 + $0x10] sm:$0xff]   ;;  %p2564_p1 = scmp.lt.s32.totalorder %s2562_s6, %s2556_s22 }
  0x8f   : > { %1282 = vmatmul.mubr.bf16.vlgmr.msra.gmra.mrb[0].mxu0 %v346_v15  ;;  %1331 = vmatprep.mubr.bf16.mxu1 %v382_v19  ;;  %v2544_v15 = vld [vmem:[%s3394_s3 + $0x50] sm:$0xff]   ;;  %v2548_v19 = vld [vmem:[%s3394_s3 + $0x60] sm:$0xff]   ;;  %p2558_p12 = pnand %p2557_p11, %p2692_p5 }
  0x90   : > { %1363 = vmatpush1.bf16.msra.mxu0 %v2537_v17  ;;  %1291 = vmatprep.mubr.bf16.mxu0 %v354_v18  ;;  %v2546_v17 = vld [vmem:[%s3394_s3 + $0x58] sm:$0xff]   ;;  %p2565_p2 = por %p2564_p1, %p2563_p0 }
  0x91   : > { %2127 = vmatpush3.bf16.msra.mxu1 %v2541_v12  ;;  %v2547_v18 = vld [vmem:[%s3394_s3 + $0x18] sm:$0xff]   ;;  %p2559_p13 = pneg %p2558_p12 }
  0x92   : > { %2128 = vmatprep.subr.bf16.mxu1 %v2542_v13 }
  0x93   : > { %p2566_p3 = pnand %p2565_p2, %p2559_p13 }
  0x95   : > { %2129 = vmatpush3.bf16.msra.mxu1 %v2543_v14 }
  0x96   : > { %1332 = vmatmul.mubr.bf16.gmra.mrb[36].mxu1 %v381_v29  ;;  %2130 = vmatprep.subr.bf16.mxu1 %v2544_v15 }
  0x97   : > { %1292 = vmatmul.mubr.bf16.gmra.mrb[4].mxu0 %v353_v28  ;;  %1341 = vmatprep.mubr.bf16.mxu1 %v389_v31 }
  0x98   : > { %1301 = vmatprep.mubr.bf16.mxu0 %v361_v30 }
  0x99   : > { %2131 = vmatpush3.bf16.msra.mxu1 %v2545_v16 }
  0x9a   : > { %2132 = vmatprep.subr.bf16.mxu1 %v2546_v17 }
  0x9d   : > { %2133 = vmatpush3.bf16.msra.mxu1 %v2547_v18 }
  0x9e   : > { %1342 = vmatmul.mubr.bf16.gmra.mrb[40].mxu1 %v388_v41  ;;  %2134 = vmatprep.subr.bf16.mxu1 %v2548_v19 }
  0x9f   : > { %1302 = vmatmul.mubr.bf16.gmra.mrb[8].mxu0 %v360_v40  ;;  %1351 = vmatprep.mubr.bf16.mxu1 %v396_v43  ;;  %v499_v40 = vshrl.u32 %v498_v36, 7 }
  0xa0   : > { %1311 = vmatprep.mubr.bf16.mxu0 %v368_v42 }
  0xa1   : > { %2135 = vmatpush3.bf16.msra.mxu1 %v2549_v20  ;;  %v500_v42 = vsub.s32 0, %v499_v40  ;;  %v504_v45 = vsub.s32 1, %v499_v40 }
  0xa2   : > { %2136 = vmatprep.subr.bf16.mxu1 %v2550_v21 }
  0xa5   : > { %2137 = vmatpush3.bf16.msra.mxu1 %v2551_v22 }
  0xa6   : > { %1352 = vmatmul.mubr.bf16.gmra.mrb[44].mxu1 %v395_v49  ;;  %2138 = vmatprep.subr.bf16.mxu1 %v2552_v23  ;;  %v3207_v49 = vrot.slane %v496_v44, %v504_v45 }
  0xa7   : > { %1312 = vmatmul.mubr.bf16.gmra.mrb[12].mxu0 %v367_v48  ;;  %v3205_v48 = vrot.slane %v496_v44, %v500_v42 }
  0xa8   : > { %1394 = vmatprep.mubr.bf16.mxu0 %v2620_v50 }
  0xa9   : > { %2139 = vmatpush3.bf16.msra.mxu1 %v2553_v24 }
  0xaa   : > { %2140 = vmatprep.subr.bf16.mxu1 %v2554_v25 }
  0xad   : > { %2141 = vmatpush3.bf16.msra.mxu1 %v2555_v26 }
  0xaf   : > { %2016 = vmatmul.mubr.msk.bf16.vlgmr.msra.gmra.mrb[0].mxu0 %vm998_vm0, %v348_v53 }
  0xb0   : > { %1404 = vmatprep.mubr.bf16.mxu0 %v2620_v50 }
  0xb7   : > { %2017 = vmatmul.mubr.msk.bf16.gmra.mrb[4].mxu0 %vm998_vm0, %v355_v56 }
  0xb8   : > { %1414 = vmatprep.mubr.bf16.mxu0 %v2620_v50 }
  0xbf   : > { %2018 = vmatmul.mubr.msk.bf16.gmra.mrb[8].mxu0 %vm998_vm0, %v362_v59 }
  0xc0   : > { %1424 = vmatprep.mubr.bf16.mxu0 %v2620_v50 }
  0xc7   : > { %2019 = vmatmul.mubr.msk.bf16.gmra.mrb[12].mxu0 %vm998_vm0, %v369_v62 }
  0xc8   : > { %1434 = vmatprep.mubr.bf16.mxu0 %v2620_v50 }
  0xcf   : > { %2020 = vmatmul.mubr.msk.bf16.gmra.mrb[32].mxu0 %vm998_vm0, %v376_v1 }
  0xd0   : > { %1444 = vmatprep.mubr.bf16.mxu0 %v2620_v50 }
  0xd7   : > { %2021 = vmatmul.mubr.msk.bf16.gmra.mrb[36].mxu0 %vm998_vm0, %v383_v4 }
  0xd8   : > { %1454 = vmatprep.mubr.bf16.mxu0 %v2620_v50 }
  0xdf   : > { %2022 = vmatmul.mubr.msk.bf16.gmra.mrb[40].mxu0 %vm998_vm0, %v390_v7 }
  0xe0   : > { %1464 = vmatprep.mubr.bf16.mxu0 %v2620_v50 }
  0xe7   : > { %2023 = vmatmul.mubr.msk.bf16.gmra.mrb[44].mxu0 %vm998_vm0, %v397_v10 }
 0x121   : > { %v3170_v27 = vpop.f32.mrb[0].mxu1 }
 0x122   : > { %v3172_v28 = vpop.f32.mrb[1].mxu1 }
 0x123   : > { %v3174_v29 = vpop.f32.mrb[2].mxu1 }
 0x124   : > { %v3176_v30 = vpop.f32.mrb[3].mxu1 }
 0x129   : > { %v3178_v31 = vpop.f32.mrb[4].mxu1 }
 0x12a   : > { %v3180_v32 = vpop.f32.mrb[5].mxu1 }
 0x12b   : > { %v3182_v33 = vpop.f32.mrb[6].mxu1 }
 0x12c   : > { %v3184_v34 = vpop.f32.mrb[7].mxu1 }
 0x131   : > { %v3186_v35 = vpop.f32.mrb[8].mxu1 }
 0x132   : > { %v3188_v37 = vpop.f32.mrb[9].mxu1 }
 0x133   : > { %v3190_v38 = vpop.f32.mrb[10].mxu1 }
 0x134   : > { %v3192_v39 = vpop.f32.mrb[11].mxu1 }
 0x139   : > { %v3194_v41 = vpop.f32.mrb[12].mxu1 }
 0x13a   : > { %v3196_v43 = vpop.f32.mrb[13].mxu1 }
 0x13b   : > { %v3201_v46 = vpop.f32.mrb[14].mxu1 }
 0x13c   : > { %v3203_v47 = vpop.f32.mrb[15].mxu1 }
 0x141   : > { %v1097_v50 = vpop.f32.mrb[16].mxu1 }
 0x142   : > { %v1210_v51 = vpop.f32.mrb[16].mxu0  ;;  %v1098_v52 = vadd.f32 %v1097_v50, %v3205_v48  ;;  %v1099_v53 = vpop.f32.mrb[17].mxu1 }
 0x143   : > { %v1212_v54 = vpop.f32.mrb[17].mxu0  ;;  %v1100_v55 = vadd.f32 %v1099_v53, %v3207_v49  ;;  %v1101_v56 = vpop.f32.mrb[18].mxu1 }
 0x144   : > { %v1214_v57 = vpop.f32.mrb[18].mxu0  ;;  %v1211_v58 = vadd.f32 %v1210_v51, %v1098_v52  ;;  %v1102_v59 = vadd.f32 %v1101_v56, %v3205_v48  ;;  %v1103_v60 = vpop.f32.mrb[19].mxu1 }
 0x145   : > { %v1216_v61 = vpop.f32.mrb[19].mxu0  ;;  %v1213_v62 = vadd.f32 %v1212_v54, %v1100_v55  ;;  %v1104_v63 = vadd.f32 %v1103_v60, %v3207_v49 }
 0x146   : > { %v1215_v0 = vadd.f32 %v1214_v57, %v1102_v59 }
 0x147   : > { %v1217_v1 = vadd.f32 %v1216_v61, %v1104_v63 }
 0x149   : > { %v1107_v2 = vpop.f32.mrb[20].mxu1 }
 0x14a   : > { %v1220_v3 = vpop.f32.mrb[20].mxu0  ;;  %v1108_v4 = vadd.f32 %v1107_v2, %v3205_v48  ;;  %v1109_v5 = vpop.f32.mrb[21].mxu1 }
 0x14b   : > { %v1222_v6 = vpop.f32.mrb[21].mxu0  ;;  %v1110_v7 = vadd.f32 %v1109_v5, %v3207_v49  ;;  %v1111_v8 = vpop.f32.mrb[22].mxu1 }
 0x14c   : > { %v1224_v9 = vpop.f32.mrb[22].mxu0  ;;  %v1221_v10 = vadd.f32 %v1220_v3, %v1108_v4  ;;  %v1112_v11 = vadd.f32 %v1111_v8, %v3205_v48  ;;  %v1113_v12 = vpop.f32.mrb[23].mxu1 }
 0x14d   : > { %v1226_v13 = vpop.f32.mrb[23].mxu0  ;;  %v1223_v14 = vadd.f32 %v1222_v6, %v1110_v7  ;;  %v1114_v15 = vadd.f32 %v1113_v12, %v3207_v49 }
 0x14e   : > { %v1225_v16 = vadd.f32 %v1224_v9, %v1112_v11 }
 0x14f   : > { %v1227_v17 = vadd.f32 %v1226_v13, %v1114_v15 }
 0x151   : > { %v1117_v18 = vpop.f32.mrb[24].mxu1 }
 0x152   : > { %v1230_v19 = vpop.f32.mrb[24].mxu0  ;;  %v1118_v20 = vadd.f32 %v1117_v18, %v3205_v48  ;;  %v1119_v21 = vpop.f32.mrb[25].mxu1 }
 0x153   : > { %v1232_v22 = vpop.f32.mrb[25].mxu0  ;;  %v1120_v23 = vadd.f32 %v1119_v21, %v3207_v49  ;;  %v1121_v24 = vpop.f32.mrb[26].mxu1 }
 0x154   : > { %v1234_v25 = vpop.f32.mrb[26].mxu0  ;;  %v1231_v26 = vadd.f32 %v1230_v19, %v1118_v20  ;;  %v1122_v36 = vadd.f32 %v1121_v24, %v3205_v48  ;;  %v1123_v40 = vpop.f32.mrb[27].mxu1 }
 0x155   : > { %v1236_v42 = vpop.f32.mrb[27].mxu0  ;;  %v1233_v44 = vadd.f32 %v1232_v22, %v1120_v23  ;;  %v1124_v45 = vadd.f32 %v1123_v40, %v3207_v49 }
 0x156   : > { %v1235_v50 = vadd.f32 %v1234_v25, %v1122_v36 }
 0x157   : > { %v1237_v51 = vadd.f32 %v1236_v42, %v1124_v45 }
 0x159   : > { %v1127_v52 = vpop.f32.mrb[28].mxu1 }
 0x15a   : > { %v1240_v53 = vpop.f32.mrb[28].mxu0  ;;  %v1128_v54 = vadd.f32 %v1127_v52, %v3205_v48  ;;  %v1129_v55 = vpop.f32.mrb[29].mxu1 }
 0x15b   : > { %v1242_v56 = vpop.f32.mrb[29].mxu0  ;;  %v1130_v57 = vadd.f32 %v1129_v55, %v3207_v49  ;;  %v1131_v59 = vpop.f32.mrb[30].mxu1 }
 0x15c   : > { %v1244_v60 = vpop.f32.mrb[30].mxu0  ;;  %v1241_v61 = vadd.f32 %v1240_v53, %v1128_v54  ;;  %v1132_v63 = vadd.f32 %v1131_v59, %v3205_v48  ;;  %v1133_v2 = vpop.f32.mrb[31].mxu1 }
 0x15d   : > { %v1246_v3 = vpop.f32.mrb[31].mxu0  ;;  %v1243_v4 = vadd.f32 %v1242_v56, %v1130_v57  ;;  %v1134_v5 = vadd.f32 %v1133_v2, %v3207_v49  ;;  %v1062_v57 = vadd.f32 %v3174_v29, %v3205_v48  ;;  %v1070_v29 = vadd.f32 %v3180_v32, %v3207_v49 }
 0x15e   : > { %v1245_v6 = vadd.f32 %v1244_v60, %v1132_v63 }
 0x15f   : > { %v1247_v7 = vadd.f32 %v1246_v3, %v1134_v5 }
 0x161   : > { %v1323_v8 = vpop.f32.mrb[32].mxu1 }
 0x162   : > { %v3225_v9 = vadd.f32 %v1323_v8, %v1211_v58  ;;  %v1325_v11 = vpop.f32.mrb[33].mxu1 }
 0x163   : > { %v3227_v12 = vadd.f32 %v1325_v11, %v1213_v62  ;;  %v1327_v13 = vpop.f32.mrb[34].mxu1 }
 0x164   : > { %v3229_v15 = vadd.f32 %v1327_v13, %v1215_v0  ;;  %v1329_v18 = vpop.f32.mrb[35].mxu1 }
 0x165   : > { %v3231_v19 = vadd.f32 %v1329_v18, %v1217_v1 }
 0x169   : > { %v1333_v20 = vpop.f32.mrb[36].mxu1 }
 0x16a   : > { %v3233_v21 = vadd.f32 %v1333_v20, %v1221_v10  ;;  %v1335_v22 = vpop.f32.mrb[37].mxu1 }
 0x16b   : > { %v3235_v23 = vadd.f32 %v1335_v22, %v1223_v14  ;;  %v1337_v24 = vpop.f32.mrb[38].mxu1 }
 0x16c   : > { %v3237_v25 = vadd.f32 %v1337_v24, %v1225_v16  ;;  %v1339_v58 = vpop.f32.mrb[39].mxu1  ;;  %v1074_v24 = vadd.f32 %v3184_v34, %v3207_v49 }
 0x16d   : > { %v3239_v36 = vadd.f32 %v1339_v58, %v1227_v17 }
 0x171   : > { %v1343_v62 = vpop.f32.mrb[40].mxu1 }
 0x172   : > { %v3241_v40 = vadd.f32 %v1343_v62, %v1231_v26  ;;  %v1345_v0 = vpop.f32.mrb[41].mxu1 }
 0x173   : > { %v3243_v42 = vadd.f32 %v1345_v0, %v1233_v44  ;;  %v1347_v1 = vpop.f32.mrb[42].mxu1  ;;  %v1058_v44 = vadd.f32 %v3170_v27, %v3205_v48 }
 0x174   : > { %v3245_v45 = vadd.f32 %v1347_v1, %v1235_v50  ;;  %v1349_v10 = vpop.f32.mrb[43].mxu1  ;;  %v1060_v50 = vadd.f32 %v3172_v28, %v3207_v49  ;;  %v1068_v28 = vadd.f32 %v3178_v31, %v3205_v48 }
 0x175   : > { %v3247_v52 = vadd.f32 %v1349_v10, %v1237_v51 }
 0x179   : > { %v1353_v14 = vpop.f32.mrb[44].mxu1 }
 0x17a   : > { %v3249_v53 = vadd.f32 %v1353_v14, %v1241_v61  ;;  %v1355_v16 = vpop.f32.mrb[45].mxu1  ;;  %v1064_v61 = vadd.f32 %v3176_v30, %v3207_v49  ;;  %v1072_v30 = vadd.f32 %v3182_v33, %v3205_v48 }
 0x17b   : > { %v3251_v54 = vadd.f32 %v1355_v16, %v1243_v4  ;;  %v1357_v17 = vpop.f32.mrb[46].mxu1 }
 0x17c   : > { %v3253_v55 = vadd.f32 %v1357_v17, %v1245_v6  ;;  %v1359_v26 = vpop.f32.mrb[47].mxu1  ;;  %v1078_v17 = vadd.f32 %v3186_v35, %v3205_v48 }
 0x17d   : > { %v3255_v56 = vadd.f32 %v1359_v26, %v1247_v7  ;;  %v1080_v26 = vadd.f32 %v3188_v37, %v3207_v49 }
 0x182   : > { %v1396_v51 = vpop.f32.mrb[0].mxu0 }
 0x183   : > { %v2223_v59 = vadd.f32 %v1396_v51, %v1058_v44  ;;  %v1398_v60 = vpop.f32.mrb[1].mxu0 }
 0x184   : > { %v2225_v63 = vadd.f32 %v1398_v60, %v1060_v50  ;;  %v1400_v2 = vpop.f32.mrb[2].mxu0  ;;  %v1082_v50 = vadd.f32 %v3190_v38, %v3205_v48 }
 0x185   : > { %v2227_v3 = vadd.f32 %v1400_v2, %v1062_v57  ;;  %v1402_v4 = vpop.f32.mrb[3].mxu0  ;;  %v1475_v6 = vmax.f32 %v2223_v59, 0.0  ;;  %v1084_v59 = vadd.f32 %v3192_v39, %v3207_v49 }
 0x186   : > { %v2229_v5 = vadd.f32 %v1402_v4, %v1064_v61  ;;  %v1476_v27 = vmax.f32 %v2225_v63, 0.0 }
 0x187   : > { %v1477_v7 = vmax.f32 %v2227_v3, 0.0 }
 0x188   : > { %v1478_v8 = vmax.f32 %v2229_v5, 0.0 }
 0x189   : > { %v1507_v11 = vpack.c.bf16 %v1477_v7, %v1475_v6  ;;  %v1088_v6 = vadd.f32 %v3194_v41, %v3205_v48  ;;  %v1090_v7 = vadd.f32 %v3196_v43, %v3207_v49 }
 0x18a   : > { %v1508_v13 = vpack.c.bf16 %v1478_v8, %v1476_v27  ;;  %v1406_v18 = vpop.f32.mrb[4].mxu0  ;;  %v1092_v8 = vadd.f32 %v3201_v46, %v3205_v48 }
 0x18b   : > { %v2231_v20 = vadd.f32 %v1406_v18, %v1068_v28  ;;  %v1408_v22 = vpop.f32.mrb[5].mxu0 }
 0x18c   : > { %v2233_v58 = vadd.f32 %v1408_v22, %v1070_v29  ;;  %v1410_v62 = vpop.f32.mrb[6].mxu0  ;;  %1690 = vmatprep.mubr.bf16.mxu1 %v1508_v13  ;;  %v1094_v29 = vadd.f32 %v3203_v47, %v3207_v49 }
 0x18d   : > { %v2235_v0 = vadd.f32 %v1410_v62, %v1072_v30  ;;  %v1412_v1 = vpop.f32.mrb[7].mxu0  ;;  %1691 = vmatmul.mubr.bf16.vlgmr.msra.gmra.mrb[48].mxu1 %v1507_v11  ;;  %v1479_v10 = vmax.f32 %v2231_v20, 0.0 }
 0x18e   : > { %v2237_v31 = vadd.f32 %v1412_v1, %v1074_v24  ;;  %v1480_v32 = vmax.f32 %v2233_v58, 0.0 }
 0x18f   : > { %v1481_v14 = vmax.f32 %v2235_v0, 0.0 }
 0x190   : > { %v1482_v16 = vmax.f32 %v2237_v31, 0.0 }
 0x191   : > { %v1509_v33 = vpack.c.bf16 %v1481_v14, %v1479_v10 }
 0x192   : > { %v1510_v44 = vpack.c.bf16 %v1482_v16, %v1480_v32  ;;  %v1416_v34 = vpop.f32.mrb[8].mxu0 }
 0x193   : > { %v2239_v51 = vadd.f32 %v1416_v34, %v1078_v17  ;;  %v1418_v57 = vpop.f32.mrb[9].mxu0 }
 0x194   : > { %v2241_v60 = vadd.f32 %v1418_v57, %v1080_v26  ;;  %v1420_v61 = vpop.f32.mrb[10].mxu0  ;;  %1698 = vmatprep.mubr.bf16.mxu1 %v1510_v44 }
 0x195   : > { %v2243_v63 = vadd.f32 %v1420_v61, %v1082_v50  ;;  %v1422_v2 = vpop.f32.mrb[11].mxu0  ;;  %1699 = vmatmul.mubr.bf16.gmra.mrb[52].mxu1 %v1509_v33  ;;  %v1483_v3 = vmax.f32 %v2239_v51, 0.0 }
 0x196   : > { %v2245_v35 = vadd.f32 %v1422_v2, %v1084_v59  ;;  %v1484_v37 = vmax.f32 %v2241_v60, 0.0 }
 0x197   : > { %v1485_v4 = vmax.f32 %v2243_v63, 0.0 }
 0x198   : > { %v1486_v5 = vmax.f32 %v2245_v35, 0.0 }
 0x199   : > { %v1511_v38 = vpack.c.bf16 %v1485_v4, %v1483_v3 }
 0x19a   : > { %v1512_v27 = vpack.c.bf16 %v1486_v5, %v1484_v37  ;;  %v1426_v39 = vpop.f32.mrb[12].mxu0 }
 0x19b   : > { %v2247_v28 = vadd.f32 %v1426_v39, %v1088_v6  ;;  %v1428_v11 = vpop.f32.mrb[13].mxu0 }
 0x19c   : > { %v2249_v13 = vadd.f32 %v1428_v11, %v1090_v7  ;;  %v1430_v18 = vpop.f32.mrb[14].mxu0  ;;  %1706 = vmatprep.mubr.bf16.mxu1 %v1512_v27 }
 0x19d   : > { %v2251_v30 = vadd.f32 %v1430_v18, %v1092_v8  ;;  %v1432_v20 = vpop.f32.mrb[15].mxu0  ;;  %1707 = vmatmul.mubr.bf16.gmra.mrb[56].mxu1 %v1511_v38  ;;  %v1487_v22 = vmax.f32 %v2247_v28, 0.0 }
 0x19e   : > { %v2253_v41 = vadd.f32 %v1432_v20, %v1094_v29  ;;  %v1488_v43 = vmax.f32 %v2249_v13, 0.0 }
 0x19f   : > { %v1489_v24 = vmax.f32 %v2251_v30, 0.0 }
 0x1a0   : > { %v1490_v58 = vmax.f32 %v2253_v41, 0.0 }
 0x1a1   : > { %v1513_v62 = vpack.c.bf16 %v1489_v24, %v1487_v22 }
 0x1a2   : > { %v1514_v0 = vpack.c.bf16 %v1490_v58, %v1488_v43  ;;  %v1436_v1 = vpop.f32.mrb[32].mxu0 }
 0x1a3   : > { %v1437_v46 = vadd.f32 %v1436_v1, %v3225_v9  ;;  %v1438_v48 = vpop.f32.mrb[33].mxu0 }
 0x1a4   : > { %v1439_v31 = vadd.f32 %v1438_v48, %v3227_v12  ;;  %v1440_v47 = vpop.f32.mrb[34].mxu0  ;;  %1714 = vmatprep.mubr.bf16.mxu1 %v1514_v0 }
 0x1a5   : > { %v1441_v49 = vadd.f32 %v1440_v47, %v3229_v15  ;;  %v1442_v10 = vpop.f32.mrb[35].mxu0  ;;  %1715 = vmatmul.mubr.bf16.gmra.mrb[60].mxu1 %v1513_v62  ;;  %v1491_v32 = vmax.f32 %v1437_v46, 0.0 }
 0x1a6   : > { %v1443_v14 = vadd.f32 %v1442_v10, %v3231_v19  ;;  %v1492_v17 = vmax.f32 %v1439_v31, 0.0 }
 0x1a7   : > { %v1493_v16 = vmax.f32 %v1441_v49, 0.0 }
 0x1a8   : > { %v1494_v33 = vmax.f32 %v1443_v14, 0.0 }
 0x1a9   : > { %v1515_v26 = vpack.c.bf16 %v1493_v16, %v1491_v32 }
 0x1aa   : > { %v1516_v44 = vpack.c.bf16 %v1494_v33, %v1492_v17  ;;  %v1446_v34 = vpop.f32.mrb[36].mxu0 }
 0x1ab   : > { %v1447_v9 = vadd.f32 %v1446_v34, %v3233_v21  ;;  %v1448_v50 = vpop.f32.mrb[37].mxu0 }
 0x1ac   : > { %v1449_v12 = vadd.f32 %v1448_v50, %v3235_v23  ;;  %v1450_v51 = vpop.f32.mrb[38].mxu0  ;;  %1722 = vmatprep.mubr.bf16.mxu1 %v1516_v44 }
 0x1ad   : > { %v1451_v15 = vadd.f32 %v1450_v51, %v3237_v25  ;;  %v1452_v57 = vpop.f32.mrb[39].mxu0  ;;  %1723 = vmatmul.mubr.bf16.gmra.mrb[64].mxu1 %v1515_v26  ;;  %v1495_v59 = vmax.f32 %v1447_v9, 0.0 }
 0x1ae   : > { %v1453_v19 = vadd.f32 %v1452_v57, %v3239_v36  ;;  %v1496_v61 = vmax.f32 %v1449_v12, 0.0 }
 0x1af   : > { %v1497_v60 = vmax.f32 %v1451_v15, 0.0 }
 0x1b0   : > { %v1498_v63 = vmax.f32 %v1453_v19, 0.0 }
 0x1b1   : > { %v1517_v2 = vpack.c.bf16 %v1497_v60, %v1495_v59 }
 0x1b2   : > { %v1518_v35 = vpack.c.bf16 %v1498_v63, %v1496_v61  ;;  %v1456_v3 = vpop.f32.mrb[40].mxu0 }
 0x1b3   : > { %v1457_v21 = vadd.f32 %v1456_v3, %v3241_v40  ;;  %v1458_v4 = vpop.f32.mrb[41].mxu0 }
 0x1b4   : > { %v1459_v23 = vadd.f32 %v1458_v4, %v3243_v42  ;;  %v1460_v37 = vpop.f32.mrb[42].mxu0  ;;  %1730 = vmatprep.mubr.bf16.mxu1 %v1518_v35 }
 0x1b5   : > { %v1461_v25 = vadd.f32 %v1460_v37, %v3245_v45  ;;  %v1462_v5 = vpop.f32.mrb[43].mxu0  ;;  %1731 = vmatmul.mubr.bf16.gmra.mrb[68].mxu1 %v1517_v2  ;;  %v1499_v6 = vmax.f32 %v1457_v21, 0.0 }
 0x1b6   : > { %v1463_v36 = vadd.f32 %v1462_v5, %v3247_v52  ;;  %v1500_v7 = vmax.f32 %v1459_v23, 0.0 }
 0x1b7   : > { %v1501_v38 = vmax.f32 %v1461_v25, 0.0 }
 0x1b8   : > { %v1502_v27 = vmax.f32 %v1463_v36, 0.0 }
 0x1b9   : > { %v1519_v39 = vpack.c.bf16 %v1501_v38, %v1499_v6 }
 0x1ba   : > { %v1520_v8 = vpack.c.bf16 %v1502_v27, %v1500_v7  ;;  %v1466_v28 = vpop.f32.mrb[44].mxu0 }
 0x1bb   : > { %v1467_v40 = vadd.f32 %v1466_v28, %v3249_v53  ;;  %v1468_v11 = vpop.f32.mrb[45].mxu0 }
 0x1bc   : > { %v1469_v42 = vadd.f32 %v1468_v11, %v3251_v54  ;;  %v1470_v29 = vpop.f32.mrb[46].mxu0  ;;  %1738 = vmatprep.mubr.bf16.mxu1 %v1520_v8 }
 0x1bd   : > { %v1471_v45 = vadd.f32 %v1470_v29, %v3253_v55  ;;  %v1472_v13 = vpop.f32.mrb[47].mxu0  ;;  %1739 = vmatmul.mubr.bf16.gmra.mrb[72].mxu1 %v1519_v39  ;;  %v1503_v18 = vmax.f32 %v1467_v40, 0.0  ;;  %v3309_v55 = vld [vmem:[%s3395_s4] ss:$0 sm:$0xff] }
 0x1be   : > { %v1473_v52 = vadd.f32 %v1472_v13, %v3255_v56  ;;  %v1504_v20 = vmax.f32 %v1469_v42, 0.0 }
 0x1bf   : > { %v1505_v30 = vmax.f32 %v1471_v45, 0.0 }
 0x1c0   : > { %v1506_v41 = vmax.f32 %v1473_v52, 0.0 }
 0x1c1   : > { %v1521_v22 = vpack.c.bf16 %v1505_v30, %v1503_v18 }
 0x1c2   : > { %v1522_v24 = vpack.c.bf16 %v1506_v41, %v1504_v20 }
 0x1c4   : > { %1746 = vmatprep.mubr.bf16.mxu1 %v1522_v24 }
 0x1c5   : > { %1747 = vmatmul.mubr.bf16.gmra.mrb[76].mxu1 %v1521_v22 }
 0x260   : > { %v2142_v53 = vpop.f32.mrb[48].mxu1 }
 0x261   : > { %v2143_v54 = vpop.f32.mrb[49].mxu1 }
 0x262   : > { %v2144_v43 = vadd.f32 %v2143_v54, %v2142_v53  ;;  %v2145_v58 = vpop.f32.mrb[50].mxu1 }
 0x263   : > { %v2146_v56 = vpop.f32.mrb[51].mxu1 }
 0x264   : > { %v2147_v62 = vadd.f32 %v2146_v56, %v2145_v58  ;;  %v1693_v0 = vadd.f32 %v2144_v43, %v3309_v55 }
 0x266   : > { %v1696_v1 = vadd.f32 %v2147_v62, %v3309_v55 }
 0x268   : > { %v2082_v46 = vpack.c.bf16 %v1696_v1, %v1693_v0  ;;  %v2148_v48 = vpop.f32.mrb[52].mxu1 }
 0x269   : > { %v2149_v31 = vpop.f32.mrb[53].mxu1 }
 0x26a   : > { %2083 = vst [vmem:[%s3315_s12] sm:$0xff] %v2082_v46   ;;  %v2150_v47 = vadd.f32 %v2149_v31, %v2148_v48  ;;  %v2151_v49 = vpop.f32.mrb[54].mxu1 }
 0x26b   : > { %v2152_v10 = vpop.f32.mrb[55].mxu1 }
 0x26c   : > { %v2153_v14 = vadd.f32 %v2152_v10, %v2151_v49  ;;  %v1701_v32 = vadd.f32 %v2150_v47, %v3309_v55 }
 0x26e   : > { %v1704_v16 = vadd.f32 %v2153_v14, %v3309_v55 }
 0x270   : > { %v2087_v17 = vpack.c.bf16 %v1704_v16, %v1701_v32  ;;  %v2154_v33 = vpop.f32.mrb[56].mxu1 }
 0x271   : > { %v2155_v26 = vpop.f32.mrb[57].mxu1 }
 0x272   : > { %2119 = vst [vmem:[%s3315_s12 + $0x8] sm:$0xff] %v2087_v17   ;;  %v2156_v44 = vadd.f32 %v2155_v26, %v2154_v33  ;;  %v2157_v34 = vpop.f32.mrb[58].mxu1 }
 0x273   : > { %v2158_v9 = vpop.f32.mrb[59].mxu1 }
 0x274   : > { %v2159_v50 = vadd.f32 %v2158_v9, %v2157_v34  ;;  %v1709_v12 = vadd.f32 %v2156_v44, %v3309_v55 }
 0x276   : > { %v1712_v51 = vadd.f32 %v2159_v50, %v3309_v55 }
 0x278   : > { %v2092_v15 = vpack.c.bf16 %v1712_v51, %v1709_v12  ;;  %v2160_v57 = vpop.f32.mrb[60].mxu1 }
 0x279   : > { %v2161_v19 = vpop.f32.mrb[61].mxu1 }
 0x27a   : > { %2120 = vst [vmem:[%s3315_s12 + $0x10] sm:$0xff] %v2092_v15   ;;  %v2162_v59 = vadd.f32 %v2161_v19, %v2160_v57  ;;  %v2163_v60 = vpop.f32.mrb[62].mxu1 }
 0x27b   : > { %v2164_v61 = vpop.f32.mrb[63].mxu1 }
 0x27c   : > { %v2165_v63 = vadd.f32 %v2164_v61, %v2163_v60  ;;  %v1717_v2 = vadd.f32 %v2162_v59, %v3309_v55 }
 0x27e   : > { %v1720_v35 = vadd.f32 %v2165_v63, %v3309_v55 }
 0x280   : > { %v2097_v3 = vpack.c.bf16 %v1720_v35, %v1717_v2  ;;  %v2166_v21 = vpop.f32.mrb[64].mxu1 }
 0x281   : > { %v2167_v4 = vpop.f32.mrb[65].mxu1 }
 0x282   : > { %2121 = vst [vmem:[%s3315_s12 + $0x18] sm:$0xff] %v2097_v3   ;;  %v2168_v23 = vadd.f32 %v2167_v4, %v2166_v21  ;;  %v2169_v37 = vpop.f32.mrb[66].mxu1 }
 0x283   : > { %v2170_v25 = vpop.f32.mrb[67].mxu1 }
 0x284   : > { %v2171_v5 = vadd.f32 %v2170_v25, %v2169_v37  ;;  %v1725_v36 = vadd.f32 %v2168_v23, %v3309_v55 }
 0x286   : > { %v1728_v6 = vadd.f32 %v2171_v5, %v3309_v55 }
 0x288   : > { %v2102_v38 = vpack.c.bf16 %v1728_v6, %v1725_v36  ;;  %v2172_v7 = vpop.f32.mrb[68].mxu1 }
 0x289   : > { %v2173_v27 = vpop.f32.mrb[69].mxu1 }
 0x28a   : > { %2122 = vst [vmem:[%s3315_s12 + $0x20] sm:$0xff] %v2102_v38   ;;  %v2174_v39 = vadd.f32 %v2173_v27, %v2172_v7  ;;  %v2175_v8 = vpop.f32.mrb[70].mxu1 }
 0x28b   : > { %v2176_v28 = vpop.f32.mrb[71].mxu1 }
 0x28c   : > { %v2177_v40 = vadd.f32 %v2176_v28, %v2175_v8  ;;  %v1733_v11 = vadd.f32 %v2174_v39, %v3309_v55 }
 0x28e   : > { %v1736_v42 = vadd.f32 %v2177_v40, %v3309_v55 }
 0x290   : > { %v2107_v29 = vpack.c.bf16 %v1736_v42, %v1733_v11  ;;  %v2178_v45 = vpop.f32.mrb[72].mxu1 }
 0x291   : > { %v2179_v13 = vpop.f32.mrb[73].mxu1 }
 0x292   : > { %2123 = vst [vmem:[%s3315_s12 + $0x28] sm:$0xff] %v2107_v29   ;;  %v2180_v52 = vadd.f32 %v2179_v13, %v2178_v45  ;;  %v2181_v18 = vpop.f32.mrb[74].mxu1 }
 0x293   : > { %v2182_v30 = vpop.f32.mrb[75].mxu1 }
 0x294   : > { %v2183_v20 = vadd.f32 %v2182_v30, %v2181_v18  ;;  %v1741_v41 = vadd.f32 %v2180_v52, %v3309_v55 }
 0x296   : > { %v1744_v22 = vadd.f32 %v2183_v20, %v3309_v55 }
 0x298   : > { %v2112_v24 = vpack.c.bf16 %v1744_v22, %v1741_v41  ;;  %v2184_v53 = vpop.f32.mrb[76].mxu1 }
 0x299   : > { %v2185_v54 = vpop.f32.mrb[77].mxu1 }
 0x29a   : > { %2124 = vst [vmem:[%s3315_s12 + $0x30] sm:$0xff] %v2112_v24   ;;  %v2186_v43 = vadd.f32 %v2185_v54, %v2184_v53  ;;  %v2187_v58 = vpop.f32.mrb[78].mxu1 }
 0x29b   : > { %v2188_v56 = vpop.f32.mrb[79].mxu1 }
 0x29c   : > { %v2189_v62 = vadd.f32 %v2188_v56, %v2187_v58  ;;  %v1749_v0 = vadd.f32 %v2186_v43, %v3309_v55 }
 0x29e   : > { %v1752_v1 = vadd.f32 %v2189_v62, %v3309_v55 }
 0x2a0   : > { %v2117_v46 = vpack.c.bf16 %v1752_v1, %v1749_v0 }
 0x2a2   : > { %2125 = vst [vmem:[%s3315_s12 + $0x38] sm:$0xff] %v2117_v46  }
 0x2a3   : > { %2569 = shalt.err (!%p2566_p3)
}
 0x2a4   : > { %s2570_s7 = scalar_lea.hbm %s3343_s16, 1024  ;;  %s2574_s9 = scalar_lea.hbm %s3396_s5, 2048 }
 0x2a5   : > { %p2571_p4 = scmp.ne.s32.totalorder %s3343_s16, %s2570_s7  ;;  %p2575_p9 = scmp.lt.u32.totalorder %s3343_s16, %s3396_s5 }
 0x2a6   : > { %p2576_p10 = scmp.lt.u32.totalorder %s2574_s9, %s2570_s7  ;;  %p2578_p12 = scmp.lt.u32.totalorder %s2570_s7, %s3343_s16 }
 0x2a7   : > { %p2572_p7 = pnand %p2571_p4, %p2692_p5 }
 0x2a8   : > { %p2577_p11 = por %p2576_p10, %p2575_p9 }
 0x2a9   : > { %p2573_p8 = pneg %p2572_p7 }
 0x2aa   : > { %p2579_p13 = por %p2578_p12, %p2577_p11 }
 0x2ac   : > { %p2580_p0 = pnand %p2579_p13, %p2573_p8 }
 0x2ae   : > { %2583 = shalt.err (!%p2580_p0)
}
 0x2af   : > { %s2622_s12 = smov 64   ;;  %s2623_s23 = smov 4  }
 0x2b0   : > { %2351 = dma.vmem_to_hbm [thread:$0]  (%p2692_p5), %s3345_s13, 1024, %s3343_s16, %s3350_s17, %s2622_s12, %s2622_s12, %s2623_s23  }
 0x2b1 PF: > { %p2357_p1 = scmp.ge.s32.totalorder %s2618_s21, 2  ;;  %s1864_s15 = sand.u32 1, %s2606_s18  }
 0x2b2   : > { %s1865_s14 = scalar_lea.sflag [#allocation3], %s1864_s15 }
 0x2b3   : > { %p2354_p2 = pnand %p2357_p1, %p2696_p6 }
 0x2b5   : > { %2601 = dma.done.wait (!%p2354_p2), %s1865_s14, 1024  }
 0x2b6   : > { %2603 = vsyncadd (!%p2354_p2), %s1865_s14, 4294966272  ;;  %p15_p3 = scmp.ge.s32.totalorder %s2679_s24, 4   ;;  %s3399_s18 = smov %s2610_s19 }
 0x2b7   : > { %s3400_s19 = smov %s2614_s20  ;;  %s3401_s20 = smov %s2690_s27 }
 0x2b8   : > { %s3402_s21 = smov %s2679_s24  ;;  %17 = sbr.rel (!%p15_p3) target bundleno = 3 (0x3), region = 75 }
 0x2bf   :  { %1870 = vsyncpa [#allocation3], 1 }
 0x2c0   :  { %1872 = vsyncpa [#allocation3 + $0x1], 1 }

</bundles_post_ra>
